<compile_context>
chip_gen: v7x
topology: tpu7x:2x2x1
jax: 0.10.0
libtpu: 0.0.40
codegen_flags: <defaults>
</compile_context>

<pallas_src>
import functools

import jax
import jax.numpy as jnp
from jax.experimental import pallas as pl
from jax.experimental.pallas import tpu as pltpu

EPS = 1e-5            # PyTorch BatchNorm1d default eps
_FMA_MAX_K = 8        # contraction dims <= this use the VPU broadcast-FMA path
_MIB = 1024 * 1024


def _vmem_limit_bytes():
    """Generation-aware VMEM limit: ~3/4 of per-core VMEM (v7x ~48 MiB, v5e/v6e ~96 MiB)."""
    ceiling = 48 * _MIB                                    # safe fallback on every gen
    try:
        cap = getattr(pltpu.get_tpu_info(), "vmem_capacity_bytes", None)
        if cap:
            ceiling = int(min((int(cap) * 3) // 4, 100 * _MIB))
    except Exception:
        pass
    return max(ceiling, 32 * _MIB)


# ------------------------------ Pallas kernel ------------------------------- #

def _sum_leading(t):
    """Sum over the (small, static) leading batch dim via unrolled vreg adds."""
    s = t[0:1]
    for b in range(1, t.shape[0]):
        s = s + t[b:b + 1]
    return s


def _bn_relu(z, gamma, beta, eps):
    """Training-mode BatchNorm (batch stats, biased var) folded to one FMA + ReLU.

    z: (B, C, P) with channels on sublanes / points on lanes.  gamma, beta: (C, 1).
    """
    inv = 1.0 / (z.shape[0] * z.shape[2])
    # Single sweep: sum & sum-of-squares. Lane reduction first (XLU), then batch adds.
    s = _sum_leading(jnp.sum(z, axis=2, keepdims=True))          # (1, C, 1)
    ss = _sum_leading(jnp.sum(z * z, axis=2, keepdims=True))     # (1, C, 1)
    mean = s * inv
    var = jnp.maximum(ss * inv - mean * mean, 0.0)               # clamp f32 cancellation
    scale = gamma * jax.lax.rsqrt(var + eps)                     # (1, C, 1) per-channel
    shift = beta - mean * scale                                  # (1, C, 1)
    return jnp.maximum(z * scale + shift, 0.0)                   # one FMA + one max


def _tnet_fused_kernel(x_ref, *refs, n_conv, n_fc, eps):
    """Whole _TNet forward in a single kernel.

    refs layout: (w_0, p_0, ..., w_{n-1}, p_{n-1}, w_last, b_last, o_ref) with
      * BN-layer weights pre-transposed to (C_out, K)      [matmul path], or
        pre-shaped to (K, C_out, 1)                        [K <= 8 VPU-FMA path];
      * p_l = stack([gamma_l, beta_l]) of shape (2, C_out, 1)  (pre-BN bias cancels);
      * w_last: (out_dim, K), b_last: (out_dim, 1).
    Activations stay (B, C, points): channels on sublanes, points on lanes.
    """
    o_ref = refs[-1]
    h = x_ref[...]                                   # (B, C_in, L): native NCL layout
    B = h.shape[0]

    def layer(h, w_ref, p_ref):
        gamma, beta = p_ref[0], p_ref[1]             # (C_out, 1) each
        if w_ref.ndim == 3:
            # Tiny contraction dim: K broadcast-FMAs on the VPU, MXU stays idle.
            z = w_ref[0] * h[:, 0:1, :]              # (C_out,1)*(B,1,L) -> (B,C_out,L)
            for k in range(1, w_ref.shape[0]):
                z = z + w_ref[k] * h[:, k:k + 1, :]
        else:
            c_out, k_dim = w_ref.shape
            w_b = jnp.broadcast_to(w_ref[...], (B, c_out, k_dim))
            z = jnp.einsum("bnk,bkl->bnl", w_b, h,
                           preferred_element_type=jnp.float32)
        return _bn_relu(z, gamma, beta, eps)

    idx = 0
    for _ in range(n_conv):                          # 1x1 conv -> BN -> ReLU stack
        h = layer(h, refs[idx], refs[idx + 1])
        idx += 2

    h = jnp.max(h, axis=2, keepdims=True)            # max-pool over points: (B, C, 1)

    for _ in range(n_fc):                            # Linear -> BN -> ReLU stack
        h = layer(h, refs[idx], refs[idx + 1])
        idx += 2

    w_last, b_last = refs[idx][...], refs[idx + 1][...]
    out_dim, k_dim = w_last.shape
    w_b = jnp.broadcast_to(w_last, (B, out_dim, k_dim))
    z = jnp.einsum("bnk,bkl->bnl", w_b, h, preferred_element_type=jnp.float32)
    o_ref[...] = (z + b_last).astype(o_ref.dtype)    # (B, out_dim, 1)


# --------------------------- pallas_call wrapper ---------------------------- #

_VMEM_SPEC = pl.BlockSpec(memory_space=pltpu.MemorySpace.VMEM)


def _layer_dims(w):
    """(K, N) for either packing of a BN-layer weight."""
    return (w.shape[0], w.shape[1]) if w.ndim == 3 else (w.shape[1], w.shape[0])


def tnet_forward(params, x):
    """x: (B, C, L) in PyTorch NCL convention (consumed natively, no host transpose).

    Returns the transformation coefficients, shape (B, out_dim).
    """
    B, _, L = x.shape
    conv, fc = params["conv"], params["fc"]
    w_last, b_last = params["last"]
    out_dim = w_last.shape[0]

    args = [x]
    flops, trans, nbytes = 0, 0, int(x.size) * 4

    def add(op):
        args.append(op)
        return int(op.size) * 4

    for (w, p) in conv:
        nbytes += add(w) + add(p)
        k, n = _layer_dims(w)
        flops += 2 * B * L * k * n + 6 * B * L * n   # matmul/FMA + folded BN/ReLU
        trans += n                                    # per-channel rsqrt
    for (w, p) in fc:
        nbytes += add(w) + add(p)
        k, n = _layer_dims(w)
        flops += 2 * B * k * n + 6 * B * n
        trans += n
    nbytes += add(w_last) + add(b_last) + B * out_dim * 4
    flops += 2 * B * w_last.shape[1] * out_dim

    out3 = pl.pallas_call(
        functools.partial(_tnet_fused_kernel, n_conv=len(conv), n_fc=len(fc), eps=EPS),
        # No grid: single invocation, whole arrays VMEM-resident -> no pipeline
        # double-buffering of the (largest) input operand.
        out_shape=jax.ShapeDtypeStruct((B, out_dim, 1), jnp.float32),
        in_specs=[_VMEM_SPEC] * len(args),
        out_specs=_VMEM_SPEC,
        compiler_params=pltpu.CompilerParams(vmem_limit_bytes=_vmem_limit_bytes()),
        cost_estimate=pl.CostEstimate(flops=flops, transcendentals=trans,
                                      bytes_accessed=nbytes),
    )(*args)
    return out3.reshape(B, out_dim)                  # drop trailing singleton (free)


# ------------------------- parameter initialization ------------------------- #

def _init_bn_layer(key, in_dim, out_dim):
    """One Conv1d(1x1)/Linear + BatchNorm1d layer, packed for the kernel.

    The Conv/Linear bias is omitted: training-mode BN subtracts the batch mean, so a
    pre-BN bias cancels exactly and would be pure wasted elementwise work.
    """
    k1, k2, k3 = jax.random.split(key, 3)
    bound = 1.0 / (in_dim ** 0.5)
    w = jax.random.uniform(k1, (in_dim, out_dim), jnp.float32, -bound, bound)
    gamma = 1.0 + 0.1 * jax.random.normal(k2, (out_dim,), jnp.float32)
    beta = 0.1 * jax.random.normal(k3, (out_dim,), jnp.float32)
    if in_dim <= _FMA_MAX_K:
        w_packed = w.reshape(in_dim, out_dim, 1)     # (K, C_out, 1): per-k sublane cols
    else:
        w_packed = w.T                               # (C_out, K): pre-transposed
    p_packed = jnp.stack([gamma, beta], axis=0).reshape(2, out_dim, 1)
    return w_packed, p_packed


def init_tnet(key, in_dim, config, out_dim):
    params = {"conv": [], "fc": []}
    dim = in_dim
    for d in config["conv_feature_extractor"]:
        key, sub = jax.random.split(key)
        params["conv"].append(_init_bn_layer(sub, dim, d))
        dim = d
    for d in config["fc_regressor"]:
        key, sub = jax.random.split(key)
        params["fc"].append(_init_bn_layer(sub, dim, d))
        dim = d
    key, kw, kb = jax.random.split(key, 3)
    bound = 1.0 / (dim ** 0.5)
    w = jax.random.uniform(kw, (dim, out_dim), jnp.float32, -bound, bound)
    b = jax.random.uniform(kb, (out_dim,), jnp.float32, -bound, bound)
    params["last"] = (w.T, b.reshape(out_dim, 1))    # (out_dim, K), (out_dim, 1)
    return params


# ----------------------------------- main ----------------------------------- #

if __name__ == "__main__":
    config = {
        "conv_feature_extractor": [32, 64],
        "fc_regressor": [64, 32],
    }
    in_dim, out_dim = 3, 9        # e.g. a learned 3x3 alignment -> 9 coefficients
    B, L = 2, 16

    key = jax.random.PRNGKey(0)
    kp, kx = jax.random.split(key)
    params = init_tnet(kp, in_dim, config, out_dim)
    x = jax.random.normal(kx, (B, in_dim, L), dtype=jnp.float32)   # native (B, C, L)

    out = jax.block_until_ready(tnet_forward(params, x))
    assert out.shape == (B, out_dim), out.shape
    print("KERNEL_OK")
</pallas_src>

<mosaic_0001>
module attributes {stable_mosaic.version = 11 : i64} {
  func.func @_tnet_fused_kernel(%arg0: memref<2x3x16xf32, #tpu.memory_space<vmem>>, %arg1: memref<3x32x1xf32, #tpu.memory_space<vmem>>, %arg2: memref<2x32x1xf32, #tpu.memory_space<vmem>>, %arg3: memref<64x32xf32, #tpu.memory_space<vmem>>, %arg4: memref<2x64x1xf32, #tpu.memory_space<vmem>>, %arg5: memref<64x64xf32, #tpu.memory_space<vmem>>, %arg6: memref<2x64x1xf32, #tpu.memory_space<vmem>>, %arg7: memref<32x64xf32, #tpu.memory_space<vmem>>, %arg8: memref<2x32x1xf32, #tpu.memory_space<vmem>>, %arg9: memref<9x32xf32, #tpu.memory_space<vmem>>, %arg10: memref<9x1xf32, #tpu.memory_space<vmem>>, %arg11: memref<2x9x1xf32, #tpu.memory_space<vmem>>) attributes {dimension_semantics = [], scalar_prefetch = 0 : i64, scratch_operands = 0 : i64, tpu.core_type = #tpu.core_type<tc>} {
    %c0 = arith.constant 0 : index
    %c0_0 = arith.constant 0 : index
    %c0_1 = arith.constant 0 : index
    %0 = vector.load %arg0[%c0, %c0_0, %c0_1] : memref<2x3x16xf32, #tpu.memory_space<vmem>>, vector<2x3x16xf32>
    %c0_2 = arith.constant 0 : index
    %c0_3 = arith.constant 0 : index
    %c0_4 = arith.constant 0 : index
    %1 = vector.load %arg2[%c0_2, %c0_3, %c0_4] : memref<2x32x1xf32, #tpu.memory_space<vmem>>, vector<1x32x1xf32>
    %2 = vector.shape_cast %1 : vector<1x32x1xf32> to vector<32x1xf32>
    %c1 = arith.constant 1 : index
    %c0_5 = arith.constant 0 : index
    %c0_6 = arith.constant 0 : index
    %3 = vector.load %arg2[%c1, %c0_5, %c0_6] : memref<2x32x1xf32, #tpu.memory_space<vmem>>, vector<1x32x1xf32>
    %4 = vector.shape_cast %3 : vector<1x32x1xf32> to vector<32x1xf32>
    %c0_7 = arith.constant 0 : index
    %c0_8 = arith.constant 0 : index
    %c0_9 = arith.constant 0 : index
    %5 = vector.load %arg1[%c0_7, %c0_8, %c0_9] : memref<3x32x1xf32, #tpu.memory_space<vmem>>, vector<1x32x1xf32>
    %6 = vector.shape_cast %5 : vector<1x32x1xf32> to vector<32x1xf32>
    %7 = vector.extract_strided_slice %0 {offsets = [0, 0, 0], sizes = [2, 1, 16], strides = [1, 1, 1]} : vector<2x3x16xf32> to vector<2x1x16xf32>
    %8 = vector.shape_cast %6 : vector<32x1xf32> to vector<1x32x1xf32>
    %9 = vector.broadcast %8 : vector<1x32x1xf32> to vector<2x32x16xf32>
    %10 = vector.broadcast %7 : vector<2x1x16xf32> to vector<2x32x16xf32>
    %11 = arith.mulf %9, %10 : vector<2x32x16xf32>
    %c1_10 = arith.constant 1 : index
    %c0_11 = arith.constant 0 : index
    %c0_12 = arith.constant 0 : index
    %12 = vector.load %arg1[%c1_10, %c0_11, %c0_12] : memref<3x32x1xf32, #tpu.memory_space<vmem>>, vector<1x32x1xf32>
    %13 = vector.shape_cast %12 : vector<1x32x1xf32> to vector<32x1xf32>
    %14 = vector.extract_strided_slice %0 {offsets = [0, 1, 0], sizes = [2, 1, 16], strides = [1, 1, 1]} : vector<2x3x16xf32> to vector<2x1x16xf32>
    %15 = vector.shape_cast %13 : vector<32x1xf32> to vector<1x32x1xf32>
    %16 = vector.broadcast %15 : vector<1x32x1xf32> to vector<2x32x16xf32>
    %17 = vector.broadcast %14 : vector<2x1x16xf32> to vector<2x32x16xf32>
    %18 = arith.mulf %16, %17 : vector<2x32x16xf32>
    %19 = arith.addf %11, %18 : vector<2x32x16xf32>
    %c2 = arith.constant 2 : index
    %c0_13 = arith.constant 0 : index
    %c0_14 = arith.constant 0 : index
    %20 = vector.load %arg1[%c2, %c0_13, %c0_14] : memref<3x32x1xf32, #tpu.memory_space<vmem>>, vector<1x32x1xf32>
    %21 = vector.shape_cast %20 : vector<1x32x1xf32> to vector<32x1xf32>
    %22 = vector.extract_strided_slice %0 {offsets = [0, 2, 0], sizes = [2, 1, 16], strides = [1, 1, 1]} : vector<2x3x16xf32> to vector<2x1x16xf32>
    %23 = vector.shape_cast %21 : vector<32x1xf32> to vector<1x32x1xf32>
    %24 = vector.broadcast %23 : vector<1x32x1xf32> to vector<2x32x16xf32>
    %25 = vector.broadcast %22 : vector<2x1x16xf32> to vector<2x32x16xf32>
    %26 = arith.mulf %24, %25 : vector<2x32x16xf32>
    %27 = arith.addf %19, %26 : vector<2x32x16xf32>
    %cst = arith.constant dense<0.000000e+00> : vector<2x32xf32>
    %28 = vector.multi_reduction <add>, %27, %cst [2] : vector<2x32x16xf32> to vector<2x32xf32>
    %29 = vector.shape_cast %28 : vector<2x32xf32> to vector<2x32x1xf32>
    %30 = vector.extract_strided_slice %29 {offsets = [0, 0, 0], sizes = [1, 32, 1], strides = [1, 1, 1]} : vector<2x32x1xf32> to vector<1x32x1xf32>
    %31 = vector.extract_strided_slice %29 {offsets = [1, 0, 0], sizes = [1, 32, 1], strides = [1, 1, 1]} : vector<2x32x1xf32> to vector<1x32x1xf32>
    %32 = arith.addf %30, %31 : vector<1x32x1xf32>
    %33 = arith.mulf %27, %27 : vector<2x32x16xf32>
    %cst_15 = arith.constant dense<0.000000e+00> : vector<2x32xf32>
    %34 = vector.multi_reduction <add>, %33, %cst_15 [2] : vector<2x32x16xf32> to vector<2x32xf32>
    %35 = vector.shape_cast %34 : vector<2x32xf32> to vector<2x32x1xf32>
    %36 = vector.extract_strided_slice %35 {offsets = [0, 0, 0], sizes = [1, 32, 1], strides = [1, 1, 1]} : vector<2x32x1xf32> to vector<1x32x1xf32>
    %37 = vector.extract_strided_slice %35 {offsets = [1, 0, 0], sizes = [1, 32, 1], strides = [1, 1, 1]} : vector<2x32x1xf32> to vector<1x32x1xf32>
    %38 = arith.addf %36, %37 : vector<1x32x1xf32>
    %cst_16 = arith.constant 3.125000e-02 : f32
    %39 = vector.broadcast %cst_16 : f32 to vector<1x32x1xf32>
    %40 = arith.mulf %32, %39 : vector<1x32x1xf32>
    %cst_17 = arith.constant 3.125000e-02 : f32
    %41 = vector.broadcast %cst_17 : f32 to vector<1x32x1xf32>
    %42 = arith.mulf %38, %41 : vector<1x32x1xf32>
    %43 = arith.mulf %40, %40 : vector<1x32x1xf32>
    %44 = arith.subf %42, %43 : vector<1x32x1xf32>
    %cst_18 = arith.constant 0.000000e+00 : f32
    %45 = vector.broadcast %cst_18 : f32 to vector<1x32x1xf32>
    %46 = arith.maximumf %44, %45 : vector<1x32x1xf32>
    %cst_19 = arith.constant 9.99999974E-6 : f32
    %47 = vector.broadcast %cst_19 : f32 to vector<1x32x1xf32>
    %48 = arith.addf %46, %47 : vector<1x32x1xf32>
    %49 = math.rsqrt %48 : vector<1x32x1xf32>
    %50 = vector.shape_cast %2 : vector<32x1xf32> to vector<1x32x1xf32>
    %51 = arith.mulf %50, %49 : vector<1x32x1xf32>
    %52 = arith.mulf %40, %51 : vector<1x32x1xf32>
    %53 = vector.shape_cast %4 : vector<32x1xf32> to vector<1x32x1xf32>
    %54 = arith.subf %53, %52 : vector<1x32x1xf32>
    %55 = vector.broadcast %51 : vector<1x32x1xf32> to vector<2x32x16xf32>
    %56 = arith.mulf %27, %55 : vector<2x32x16xf32>
    %57 = vector.broadcast %54 : vector<1x32x1xf32> to vector<2x32x16xf32>
    %58 = arith.addf %56, %57 : vector<2x32x16xf32>
    %cst_20 = arith.constant 0.000000e+00 : f32
    %59 = vector.broadcast %cst_20 : f32 to vector<2x32x16xf32>
    %60 = arith.maximumf %58, %59 : vector<2x32x16xf32>
    %c0_21 = arith.constant 0 : index
    %c0_22 = arith.constant 0 : index
    %c0_23 = arith.constant 0 : index
    %61 = vector.load %arg4[%c0_21, %c0_22, %c0_23] : memref<2x64x1xf32, #tpu.memory_space<vmem>>, vector<1x64x1xf32>
    %62 = vector.shape_cast %61 : vector<1x64x1xf32> to vector<64x1xf32>
    %c1_24 = arith.constant 1 : index
    %c0_25 = arith.constant 0 : index
    %c0_26 = arith.constant 0 : index
    %63 = vector.load %arg4[%c1_24, %c0_25, %c0_26] : memref<2x64x1xf32, #tpu.memory_space<vmem>>, vector<1x64x1xf32>
    %64 = vector.shape_cast %63 : vector<1x64x1xf32> to vector<64x1xf32>
    %c0_27 = arith.constant 0 : index
    %c0_28 = arith.constant 0 : index
    %65 = vector.load %arg3[%c0_27, %c0_28] : memref<64x32xf32, #tpu.memory_space<vmem>>, vector<64x32xf32>
    %66 = vector.shape_cast %65 : vector<64x32xf32> to vector<1x64x32xf32>
    %67 = vector.broadcast %66 : vector<1x64x32xf32> to vector<2x64x32xf32>
    "tpu.trace_start"() <{level = 10 : i32, message = "bnk,bkl->bnl"}> : () -> ()
    %cst_29 = arith.constant dense<0.000000e+00> : vector<2x64x16xf32>
    %68 = tpu.matmul %67, %60, %cst_29 {dimension_numbers = #tpu.dot_dimension_numbers<[2], [1], [1], [2], [0, 0, 0, 1, 1, 2], [0], [0]>} : vector<2x64x32xf32>, vector<2x32x16xf32>, vector<2x64x16xf32> -> vector<2x64x16xf32>
    "tpu.trace_stop"() : () -> ()
    %cst_30 = arith.constant dense<0.000000e+00> : vector<2x64xf32>
    %69 = vector.multi_reduction <add>, %68, %cst_30 [2] : vector<2x64x16xf32> to vector<2x64xf32>
    %70 = vector.shape_cast %69 : vector<2x64xf32> to vector<2x64x1xf32>
    %71 = vector.extract_strided_slice %70 {offsets = [0, 0, 0], sizes = [1, 64, 1], strides = [1, 1, 1]} : vector<2x64x1xf32> to vector<1x64x1xf32>
    %72 = vector.extract_strided_slice %70 {offsets = [1, 0, 0], sizes = [1, 64, 1], strides = [1, 1, 1]} : vector<2x64x1xf32> to vector<1x64x1xf32>
    %73 = arith.addf %71, %72 : vector<1x64x1xf32>
    %74 = arith.mulf %68, %68 : vector<2x64x16xf32>
    %cst_31 = arith.constant dense<0.000000e+00> : vector<2x64xf32>
    %75 = vector.multi_reduction <add>, %74, %cst_31 [2] : vector<2x64x16xf32> to vector<2x64xf32>
    %76 = vector.shape_cast %75 : vector<2x64xf32> to vector<2x64x1xf32>
    %77 = vector.extract_strided_slice %76 {offsets = [0, 0, 0], sizes = [1, 64, 1], strides = [1, 1, 1]} : vector<2x64x1xf32> to vector<1x64x1xf32>
    %78 = vector.extract_strided_slice %76 {offsets = [1, 0, 0], sizes = [1, 64, 1], strides = [1, 1, 1]} : vector<2x64x1xf32> to vector<1x64x1xf32>
    %79 = arith.addf %77, %78 : vector<1x64x1xf32>
    %cst_32 = arith.constant 3.125000e-02 : f32
    %80 = vector.broadcast %cst_32 : f32 to vector<1x64x1xf32>
    %81 = arith.mulf %73, %80 : vector<1x64x1xf32>
    %cst_33 = arith.constant 3.125000e-02 : f32
    %82 = vector.broadcast %cst_33 : f32 to vector<1x64x1xf32>
    %83 = arith.mulf %79, %82 : vector<1x64x1xf32>
    %84 = arith.mulf %81, %81 : vector<1x64x1xf32>
    %85 = arith.subf %83, %84 : vector<1x64x1xf32>
    %cst_34 = arith.constant 0.000000e+00 : f32
    %86 = vector.broadcast %cst_34 : f32 to vector<1x64x1xf32>
    %87 = arith.maximumf %85, %86 : vector<1x64x1xf32>
    %cst_35 = arith.constant 9.99999974E-6 : f32
    %88 = vector.broadcast %cst_35 : f32 to vector<1x64x1xf32>
    %89 = arith.addf %87, %88 : vector<1x64x1xf32>
    %90 = math.rsqrt %89 : vector<1x64x1xf32>
    %91 = vector.shape_cast %62 : vector<64x1xf32> to vector<1x64x1xf32>
    %92 = arith.mulf %91, %90 : vector<1x64x1xf32>
    %93 = arith.mulf %81, %92 : vector<1x64x1xf32>
    %94 = vector.shape_cast %64 : vector<64x1xf32> to vector<1x64x1xf32>
    %95 = arith.subf %94, %93 : vector<1x64x1xf32>
    %96 = vector.broadcast %92 : vector<1x64x1xf32> to vector<2x64x16xf32>
    %97 = arith.mulf %68, %96 : vector<2x64x16xf32>
    %98 = vector.broadcast %95 : vector<1x64x1xf32> to vector<2x64x16xf32>
    %99 = arith.addf %97, %98 : vector<2x64x16xf32>
    %cst_36 = arith.constant 0.000000e+00 : f32
    %100 = vector.broadcast %cst_36 : f32 to vector<2x64x16xf32>
    %101 = arith.maximumf %99, %100 : vector<2x64x16xf32>
    %cst_37 = arith.constant dense<0xFF800000> : vector<2x64xf32>
    %102 = vector.multi_reduction <maximumf>, %101, %cst_37 [2] : vector<2x64x16xf32> to vector<2x64xf32>
    %103 = vector.shape_cast %102 : vector<2x64xf32> to vector<2x64x1xf32>
    %c0_38 = arith.constant 0 : index
    %c0_39 = arith.constant 0 : index
    %c0_40 = arith.constant 0 : index
    %104 = vector.load %arg6[%c0_38, %c0_39, %c0_40] : memref<2x64x1xf32, #tpu.memory_space<vmem>>, vector<1x64x1xf32>
    %105 = vector.shape_cast %104 : vector<1x64x1xf32> to vector<64x1xf32>
    %c1_41 = arith.constant 1 : index
    %c0_42 = arith.constant 0 : index
    %c0_43 = arith.constant 0 : index
    %106 = vector.load %arg6[%c1_41, %c0_42, %c0_43] : memref<2x64x1xf32, #tpu.memory_space<vmem>>, vector<1x64x1xf32>
    %107 = vector.shape_cast %106 : vector<1x64x1xf32> to vector<64x1xf32>
    %c0_44 = arith.constant 0 : index
    %c0_45 = arith.constant 0 : index
    %108 = vector.load %arg5[%c0_44, %c0_45] : memref<64x64xf32, #tpu.memory_space<vmem>>, vector<64x64xf32>
    %109 = vector.shape_cast %108 : vector<64x64xf32> to vector<1x64x64xf32>
    %110 = vector.broadcast %109 : vector<1x64x64xf32> to vector<2x64x64xf32>
    "tpu.trace_start"() <{level = 10 : i32, message = "bnk,bkl->bnl"}> : () -> ()
    %cst_46 = arith.constant dense<0.000000e+00> : vector<2x64x1xf32>
    %111 = tpu.matmul %110, %103, %cst_46 {dimension_numbers = #tpu.dot_dimension_numbers<[2], [1], [1], [2], [0, 0, 0, 1, 1, 2], [0], [0]>} : vector<2x64x64xf32>, vector<2x64x1xf32>, vector<2x64x1xf32> -> vector<2x64x1xf32>
    "tpu.trace_stop"() : () -> ()
    %cst_47 = arith.constant dense<0.000000e+00> : vector<2x64xf32>
    %112 = vector.multi_reduction <add>, %111, %cst_47 [2] : vector<2x64x1xf32> to vector<2x64xf32>
    %113 = vector.shape_cast %112 : vector<2x64xf32> to vector<2x64x1xf32>
    %114 = vector.extract_strided_slice %113 {offsets = [0, 0, 0], sizes = [1, 64, 1], strides = [1, 1, 1]} : vector<2x64x1xf32> to vector<1x64x1xf32>
    %115 = vector.extract_strided_slice %113 {offsets = [1, 0, 0], sizes = [1, 64, 1], strides = [1, 1, 1]} : vector<2x64x1xf32> to vector<1x64x1xf32>
    %116 = arith.addf %114, %115 : vector<1x64x1xf32>
    %117 = arith.mulf %111, %111 : vector<2x64x1xf32>
    %cst_48 = arith.constant dense<0.000000e+00> : vector<2x64xf32>
    %118 = vector.multi_reduction <add>, %117, %cst_48 [2] : vector<2x64x1xf32> to vector<2x64xf32>
    %119 = vector.shape_cast %118 : vector<2x64xf32> to vector<2x64x1xf32>
    %120 = vector.extract_strided_slice %119 {offsets = [0, 0, 0], sizes = [1, 64, 1], strides = [1, 1, 1]} : vector<2x64x1xf32> to vector<1x64x1xf32>
    %121 = vector.extract_strided_slice %119 {offsets = [1, 0, 0], sizes = [1, 64, 1], strides = [1, 1, 1]} : vector<2x64x1xf32> to vector<1x64x1xf32>
    %122 = arith.addf %120, %121 : vector<1x64x1xf32>
    %cst_49 = arith.constant 5.000000e-01 : f32
    %123 = vector.broadcast %cst_49 : f32 to vector<1x64x1xf32>
    %124 = arith.mulf %116, %123 : vector<1x64x1xf32>
    %cst_50 = arith.constant 5.000000e-01 : f32
    %125 = vector.broadcast %cst_50 : f32 to vector<1x64x1xf32>
    %126 = arith.mulf %122, %125 : vector<1x64x1xf32>
    %127 = arith.mulf %124, %124 : vector<1x64x1xf32>
    %128 = arith.subf %126, %127 : vector<1x64x1xf32>
    %cst_51 = arith.constant 0.000000e+00 : f32
    %129 = vector.broadcast %cst_51 : f32 to vector<1x64x1xf32>
    %130 = arith.maximumf %128, %129 : vector<1x64x1xf32>
    %cst_52 = arith.constant 9.99999974E-6 : f32
    %131 = vector.broadcast %cst_52 : f32 to vector<1x64x1xf32>
    %132 = arith.addf %130, %131 : vector<1x64x1xf32>
    %133 = math.rsqrt %132 : vector<1x64x1xf32>
    %134 = vector.shape_cast %105 : vector<64x1xf32> to vector<1x64x1xf32>
    %135 = arith.mulf %134, %133 : vector<1x64x1xf32>
    %136 = arith.mulf %124, %135 : vector<1x64x1xf32>
    %137 = vector.shape_cast %107 : vector<64x1xf32> to vector<1x64x1xf32>
    %138 = arith.subf %137, %136 : vector<1x64x1xf32>
    %139 = vector.broadcast %135 : vector<1x64x1xf32> to vector<2x64x1xf32>
    %140 = arith.mulf %111, %139 : vector<2x64x1xf32>
    %141 = vector.broadcast %138 : vector<1x64x1xf32> to vector<2x64x1xf32>
    %142 = arith.addf %140, %141 : vector<2x64x1xf32>
    %cst_53 = arith.constant 0.000000e+00 : f32
    %143 = vector.broadcast %cst_53 : f32 to vector<2x64x1xf32>
    %144 = arith.maximumf %142, %143 : vector<2x64x1xf32>
    %c0_54 = arith.constant 0 : index
    %c0_55 = arith.constant 0 : index
    %c0_56 = arith.constant 0 : index
    %145 = vector.load %arg8[%c0_54, %c0_55, %c0_56] : memref<2x32x1xf32, #tpu.memory_space<vmem>>, vector<1x32x1xf32>
    %146 = vector.shape_cast %145 : vector<1x32x1xf32> to vector<32x1xf32>
    %c1_57 = arith.constant 1 : index
    %c0_58 = arith.constant 0 : index
    %c0_59 = arith.constant 0 : index
    %147 = vector.load %arg8[%c1_57, %c0_58, %c0_59] : memref<2x32x1xf32, #tpu.memory_space<vmem>>, vector<1x32x1xf32>
    %148 = vector.shape_cast %147 : vector<1x32x1xf32> to vector<32x1xf32>
    %c0_60 = arith.constant 0 : index
    %c0_61 = arith.constant 0 : index
    %149 = vector.load %arg7[%c0_60, %c0_61] : memref<32x64xf32, #tpu.memory_space<vmem>>, vector<32x64xf32>
    %150 = vector.shape_cast %149 : vector<32x64xf32> to vector<1x32x64xf32>
    %151 = vector.broadcast %150 : vector<1x32x64xf32> to vector<2x32x64xf32>
    "tpu.trace_start"() <{level = 10 : i32, message = "bnk,bkl->bnl"}> : () -> ()
    %cst_62 = arith.constant dense<0.000000e+00> : vector<2x32x1xf32>
    %152 = tpu.matmul %151, %144, %cst_62 {dimension_numbers = #tpu.dot_dimension_numbers<[2], [1], [1], [2], [0, 0, 0, 1, 1, 2], [0], [0]>} : vector<2x32x64xf32>, vector<2x64x1xf32>, vector<2x32x1xf32> -> vector<2x32x1xf32>
    "tpu.trace_stop"() : () -> ()
    %cst_63 = arith.constant dense<0.000000e+00> : vector<2x32xf32>
    %153 = vector.multi_reduction <add>, %152, %cst_63 [2] : vector<2x32x1xf32> to vector<2x32xf32>
    %154 = vector.shape_cast %153 : vector<2x32xf32> to vector<2x32x1xf32>
    %155 = vector.extract_strided_slice %154 {offsets = [0, 0, 0], sizes = [1, 32, 1], strides = [1, 1, 1]} : vector<2x32x1xf32> to vector<1x32x1xf32>
    %156 = vector.extract_strided_slice %154 {offsets = [1, 0, 0], sizes = [1, 32, 1], strides = [1, 1, 1]} : vector<2x32x1xf32> to vector<1x32x1xf32>
    %157 = arith.addf %155, %156 : vector<1x32x1xf32>
    %158 = arith.mulf %152, %152 : vector<2x32x1xf32>
    %cst_64 = arith.constant dense<0.000000e+00> : vector<2x32xf32>
    %159 = vector.multi_reduction <add>, %158, %cst_64 [2] : vector<2x32x1xf32> to vector<2x32xf32>
    %160 = vector.shape_cast %159 : vector<2x32xf32> to vector<2x32x1xf32>
    %161 = vector.extract_strided_slice %160 {offsets = [0, 0, 0], sizes = [1, 32, 1], strides = [1, 1, 1]} : vector<2x32x1xf32> to vector<1x32x1xf32>
    %162 = vector.extract_strided_slice %160 {offsets = [1, 0, 0], sizes = [1, 32, 1], strides = [1, 1, 1]} : vector<2x32x1xf32> to vector<1x32x1xf32>
    %163 = arith.addf %161, %162 : vector<1x32x1xf32>
    %cst_65 = arith.constant 5.000000e-01 : f32
    %164 = vector.broadcast %cst_65 : f32 to vector<1x32x1xf32>
    %165 = arith.mulf %157, %164 : vector<1x32x1xf32>
    %cst_66 = arith.constant 5.000000e-01 : f32
    %166 = vector.broadcast %cst_66 : f32 to vector<1x32x1xf32>
    %167 = arith.mulf %163, %166 : vector<1x32x1xf32>
    %168 = arith.mulf %165, %165 : vector<1x32x1xf32>
    %169 = arith.subf %167, %168 : vector<1x32x1xf32>
    %cst_67 = arith.constant 0.000000e+00 : f32
    %170 = vector.broadcast %cst_67 : f32 to vector<1x32x1xf32>
    %171 = arith.maximumf %169, %170 : vector<1x32x1xf32>
    %cst_68 = arith.constant 9.99999974E-6 : f32
    %172 = vector.broadcast %cst_68 : f32 to vector<1x32x1xf32>
    %173 = arith.addf %171, %172 : vector<1x32x1xf32>
    %174 = math.rsqrt %173 : vector<1x32x1xf32>
    %175 = vector.shape_cast %146 : vector<32x1xf32> to vector<1x32x1xf32>
    %176 = arith.mulf %175, %174 : vector<1x32x1xf32>
    %177 = arith.mulf %165, %176 : vector<1x32x1xf32>
    %178 = vector.shape_cast %148 : vector<32x1xf32> to vector<1x32x1xf32>
    %179 = arith.subf %178, %177 : vector<1x32x1xf32>
    %180 = vector.broadcast %176 : vector<1x32x1xf32> to vector<2x32x1xf32>
    %181 = arith.mulf %152, %180 : vector<2x32x1xf32>
    %182 = vector.broadcast %179 : vector<1x32x1xf32> to vector<2x32x1xf32>
    %183 = arith.addf %181, %182 : vector<2x32x1xf32>
    %cst_69 = arith.constant 0.000000e+00 : f32
    %184 = vector.broadcast %cst_69 : f32 to vector<2x32x1xf32>
    %185 = arith.maximumf %183, %184 : vector<2x32x1xf32>
    %c0_70 = arith.constant 0 : index
    %c0_71 = arith.constant 0 : index
    %186 = vector.load %arg9[%c0_70, %c0_71] : memref<9x32xf32, #tpu.memory_space<vmem>>, vector<9x32xf32>
    %c0_72 = arith.constant 0 : index
    %c0_73 = arith.constant 0 : index
    %187 = vector.load %arg10[%c0_72, %c0_73] : memref<9x1xf32, #tpu.memory_space<vmem>>, vector<9x1xf32>
    %188 = vector.shape_cast %186 : vector<9x32xf32> to vector<1x9x32xf32>
    %189 = vector.broadcast %188 : vector<1x9x32xf32> to vector<2x9x32xf32>
    "tpu.trace_start"() <{level = 10 : i32, message = "bnk,bkl->bnl"}> : () -> ()
    %cst_74 = arith.constant dense<0.000000e+00> : vector<2x9x1xf32>
    %190 = tpu.matmul %189, %185, %cst_74 {dimension_numbers = #tpu.dot_dimension_numbers<[2], [1], [1], [2], [0, 0, 0, 1, 1, 2], [0], [0]>} : vector<2x9x32xf32>, vector<2x32x1xf32>, vector<2x9x1xf32> -> vector<2x9x1xf32>
    "tpu.trace_stop"() : () -> ()
    %191 = vector.shape_cast %187 : vector<9x1xf32> to vector<1x9x1xf32>
    %192 = vector.broadcast %191 : vector<1x9x1xf32> to vector<2x9x1xf32>
    %193 = arith.addf %190, %192 : vector<2x9x1xf32>
    %c0_75 = arith.constant 0 : index
    %c0_76 = arith.constant 0 : index
    %c0_77 = arith.constant 0 : index
    %194 = vector.load %arg11[%c0_75, %c0_76, %c0_77] : memref<2x9x1xf32, #tpu.memory_space<vmem>>, vector<2x9x1xf32>
    tpu.vector_store %arg11[%c0_75, %c0_76, %c0_77], %193 {strides = array<i32>} : memref<2x9x1xf32, #tpu.memory_space<vmem>>, vector<2x9x1xf32>,
    return
  }
}

</mosaic_0001>

<bundles_post_ra>
// kernel: tpu_custom_call.1
= control target key start
LH: loop header
LB: loop body
LE: loop exit
PB: predicated region body
PF: predicated region fallthrough
CT: control target
= control target key end

     0   :  { %v2390_v0 = vmov 0   ;;  %v73_v13 = vlaneseq  ;;  %vm187_vm0 = vcmask 130048   ;;  %vm381_vm1 = vcmask 261120   ;;  %s3165_s1 = inlined_call_operand.vmem [shape: f32[3,32,1], index: 1, kind: input, shape index: {}]   ;;  %s3166_s0 = inlined_call_operand.vmem [shape: f32[2,3,16], index: 0, kind: input, shape index: {}]   ;;  %s3167_s2 = inlined_call_operand.vmem [shape: f32[2,32,1], index: 2, kind: input, shape index: {}]   ;;  %s3168_s3 = inlined_call_operand.vmem [shape: f32[64,32], index: 3, kind: input, shape index: {}]   ;;  %s3169_s4 = inlined_call_operand.vmem [shape: f32[2,64,1], index: 4, kind: input, shape index: {}]   ;;  %s3170_s5 = inlined_call_operand.vmem [shape: f32[64,64], index: 5, kind: input, shape index: {}]   ;;  %s3171_s7 = inlined_call_operand.vmem [shape: f32[32,64], index: 7, kind: input, shape index: {}]   ;;  %s3172_s6 = inlined_call_operand.vmem [shape: f32[2,64,1], index: 6, kind: input, shape index: {}]   ;;  %s3173_s9 = inlined_call_operand.vmem [shape: f32[9,32], index: 9, kind: input, shape index: {}]   ;;  %s3174_s8 = inlined_call_operand.vmem [shape: f32[2,32,1], index: 8, kind: input, shape index: {}]   ;;  %s3175_s10 = inlined_call_operand.vmem [shape: f32[9,1], index: 10, kind: input, shape index: {}]   ;;  %s3176_s11 = inlined_call_operand.vmem [shape: f32[2,9,1], index: 11, kind: output, shape index: {}]  }
   0x1   :  { %2341 = vset.pattern.permute.xlu1 %v2390_v0  ;;  %2340 = vset.pattern.permute.xlu0 %v2390_v0  ;;  %v1917_v1 = vld [vmem:[%s3165_s1 + $0x20] sm:$0xff]  ;;  %v1918_v3 = vld [vmem:[%s3165_s1 + $0x28] sm:$0xff]  ;;  %v52_v7 = vld [vmem:[%s3165_s1 + $0x18] sm:$0xff]  ;;  %vm1025_vm2 = vcmask 523264   ;;  %vm1905_vm3 = vcmask 0   ;;  %vm1903_vm4 = vcmask 7168  }
   0x2   :  { %v49_v2 = vld [vmem:[%s3165_s1] sm:$0xff]  ;;  %96 = vperm.xlu1 %2341, %v1917_v1   ;;  %v50_v4 = vld [vmem:[%s3165_s1 + $0x8] sm:$0xff]  ;;  %v51_v8 = vld [vmem:[%s3165_s1 + $0x10] sm:$0xff]  ;;  %v74_v14 = vshrl.u32 %v73_v13, 7 }
   0x3   :  { %55 = vperm.xlu0 %2340, %v49_v2   ;;  %v1922_v5 = vld [vmem:[%s3165_s1 + $0x48] sm:$0xff]  ;;  %v1921_v6 = vld [vmem:[%s3165_s1 + $0x40] sm:$0xff]  ;;  %v1920_v9 = vld [vmem:[%s3165_s1 + $0x38] sm:$0xff] }
   0x4   :  { %v1919_v10 = vld [vmem:[%s3165_s1 + $0x30] sm:$0xff]  ;;  %v1924_v11 = vld [vmem:[%s3165_s1 + $0x58] sm:$0xff]  ;;  %v116_v15 = vsub.s32 1, %v74_v14  ;;  %v75_v16 = vsub.s32 0, %v74_v14  ;;  %v38_v17 = vld [vmem:[%s3166_s0] sm:$0x7] }
   0x5   :  { %v1923_v12 = vld [vmem:[%s3165_s1 + $0x50] sm:$0xff]  ;;  %v165_v20 = vsub.s32 2, %v74_v14  ;;  %v39_v21 = vld [vmem:[%s3166_s0 + $0x4] sm:$0x7] }
   0x6   :  { %101 = vperm.xlu1 %2341, %v1918_v3   ;;  %v117_v22 = vrot.slane %v38_v17, %v116_v15  ;;  %v76_v23 = vrot.slane %v38_v17, %v75_v16  ;;  %v121_v24 = vrot.slane %v39_v21, %v116_v15  ;;  %v80_v25 = vrot.slane %v39_v21, %v75_v16 }
   0x7   :  { %60 = vperm.xlu0 %2340, %v50_v4   ;;  %v166_v28 = vrot.slane %v38_v17, %v165_v20  ;;  %v170_v33 = vrot.slane %v39_v21, %v165_v20 }
   0xa   :  { %150 = vperm.xlu1 %2341, %v1922_v5  }
   0xb   :  { %145 = vperm.xlu0 %2340, %v1921_v6  }
   0xe   :  { %70 = vperm.xlu1 %2341, %v52_v7  }
   0xf   :  { %65 = vperm.xlu0 %2340, %v51_v8  }
  0x12   :  { %111 = vperm.xlu1 %2341, %v1920_v9  }
  0x13   :  { %106 = vperm.xlu0 %2340, %v1919_v10  }
  0x16   :  { %160 = vperm.xlu1 %2341, %v1924_v11  }
  0x17   :  { %155 = vperm.xlu0 %2340, %v1923_v12  }
  0x81   :  { %v97_v18 = vpop.permute.xlu1 %96 }
  0x82   :  { %v56_v19 = vpop.permute.xlu0 %55  ;;  %v122_v29 = vmul.f32 %v117_v22, %v97_v18  ;;  %v126_v34 = vmul.f32 %v121_v24, %v97_v18 }
  0x83   :  { %v81_v30 = vmul.f32 %v76_v23, %v56_v19  ;;  %v85_v35 = vmul.f32 %v80_v25, %v56_v19 }
  0x85   :  { %v102_v26 = vpop.permute.xlu1 %101  ;;  %v130_v38 = vadd.f32 %v122_v29, %v81_v30  ;;  %v134_v45 = vadd.f32 %v126_v34, %v85_v35 }
  0x86   :  { %v61_v27 = vpop.permute.xlu0 %60  ;;  %v123_v31 = vmul.f32 %v117_v22, %v102_v26  ;;  %v127_v46 = vmul.f32 %v121_v24, %v102_v26 }
  0x87   :  { %v82_v32 = vmul.f32 %v76_v23, %v61_v27  ;;  %v86_v47 = vmul.f32 %v80_v25, %v61_v27 }
  0x89   :  { %v151_v36 = vpop.permute.xlu1 %150  ;;  %v131_v39 = vadd.f32 %v123_v31, %v82_v32  ;;  %v135_v54 = vadd.f32 %v127_v46, %v86_v47 }
  0x8a   :  { %v146_v37 = vpop.permute.xlu0 %145  ;;  %v172_v40 = vmul.f32 %v166_v28, %v151_v36  ;;  %v176_v50 = vmul.f32 %v170_v33, %v151_v36 }
  0x8b   :  { %v171_v41 = vmul.f32 %v166_v28, %v146_v37  ;;  %v175_v42 = vmul.f32 %v170_v33, %v146_v37 }
  0x8c   :  { %v2493_v43 = vadd.f32 %v172_v40, %v131_v39  ;;  %v2503_v59 = vadd.f32 %v176_v50, %v135_v54 }
  0x8d   :  { %v2495_v44 = vadd.f32 %v171_v41, %v130_v38  ;;  %v71_v48 = vpop.permute.xlu1 %70  ;;  %v2497_v51 = vadd.f32 %v175_v42, %v134_v45 }
  0x8e   :  { %v66_v49 = vpop.permute.xlu0 %65  ;;  %v191_v52 = vsel %vm187_vm0, %v2493_v43, 0.0  ;;  %v84_v60 = vmul.f32 %v76_v23, %v71_v48  ;;  %v88_v9 = vmul.f32 %v80_v25, %v71_v48  ;;  %v203_v11 = vsel %vm187_vm0, %v2503_v59, 0.0 }
  0x8f   :  { %v188_v53 = vsel %vm187_vm0, %v2495_v44, 0.0  ;;  %192 = vadd.xlane.f32.xlu1 %v191_v52  ;;  %v200_v61 = vsel %vm187_vm0, %v2497_v51, 0.0  ;;  %v83_v62 = vmul.f32 %v76_v23, %v66_v49  ;;  %v87_v0 = vmul.f32 %v80_v25, %v66_v49 }
  0x90   :  { %189 = vadd.xlane.f32.xlu0 %v188_v53  ;;  %v216_v21 = vmul.f32 %v2495_v44, %v2495_v44  ;;  %v217_v23 = vmul.f32 %v2493_v43, %v2493_v43  ;;  %v220_v25 = vmul.f32 %v2497_v51, %v2497_v51  ;;  %v221_v27 = vmul.f32 %v2503_v59, %v2503_v59 }
  0x91   :  { %v112_v55 = vpop.permute.xlu1 %111 }
  0x92   :  { %v107_v56 = vpop.permute.xlu0 %106  ;;  %v125_v57 = vmul.f32 %v117_v22, %v112_v55  ;;  %v129_v1 = vmul.f32 %v121_v24, %v112_v55  ;;  %v227_v26 = vsel %vm187_vm0, %v217_v23, 0.0  ;;  %v239_v30 = vsel %vm187_vm0, %v221_v27, 0.0 }
  0x93   :  { %v124_v58 = vmul.f32 %v117_v22, %v107_v56  ;;  %v128_v63 = vmul.f32 %v121_v24, %v107_v56  ;;  %v224_v24 = vsel %vm187_vm0, %v216_v21, 0.0 }
  0x94   :  { %201 = vadd.xlane.f32.xlu0 %v200_v61  ;;  %v133_v2 = vadd.f32 %v125_v57, %v84_v60  ;;  %v137_v15 = vadd.f32 %v129_v1, %v88_v9 }
  0x95   :  { %v161_v3 = vpop.permute.xlu1 %160  ;;  %v132_v5 = vadd.f32 %v124_v58, %v83_v62  ;;  %v136_v12 = vadd.f32 %v128_v63, %v87_v0 }
  0x96   :  { %v156_v4 = vpop.permute.xlu0 %155  ;;  %v174_v6 = vmul.f32 %v166_v28, %v161_v3  ;;  %v178_v10 = vmul.f32 %v170_v33, %v161_v3 }
  0x97   :  { %v173_v7 = vmul.f32 %v166_v28, %v156_v4  ;;  %v177_v8 = vmul.f32 %v170_v33, %v156_v4  ;;  %v236_v28 = vsel %vm187_vm0, %v220_v25, 0.0 }
  0x98   :  { %v2509_v13 = vadd.f32 %v174_v6, %v133_v2  ;;  %204 = vadd.xlane.f32.xlu0 %v203_v11  ;;  %v2519_v19 = vadd.f32 %v178_v10, %v137_v15 }
  0x99   :  { %v2511_v14 = vadd.f32 %v173_v7, %v132_v5  ;;  %v2513_v16 = vadd.f32 %v177_v8, %v136_v12 }
  0x9a   :  { %v197_v18 = vsel %vm187_vm0, %v2509_v13, 0.0  ;;  %v209_v22 = vsel %vm187_vm0, %v2519_v19, 0.0  ;;  %v219_v31 = vmul.f32 %v2509_v13, %v2509_v13  ;;  %v223_v35 = vmul.f32 %v2519_v19, %v2519_v19 }
  0x9b   :  { %v194_v17 = vsel %vm187_vm0, %v2511_v14, 0.0  ;;  %v206_v20 = vsel %vm187_vm0, %v2513_v16, 0.0  ;;  %v218_v29 = vmul.f32 %v2511_v14, %v2511_v14  ;;  %v222_v33 = vmul.f32 %v2513_v16, %v2513_v16 }
  0x9c   :  { %195 = vadd.xlane.f32.xlu1 %v194_v17  ;;  %198 = vadd.xlane.f32.xlu0 %v197_v18  ;;  %v233_v34 = vsel %vm187_vm0, %v219_v31, 0.0  ;;  %v245_v37 = vsel %vm187_vm0, %v223_v35, 0.0  ;;  %v41_v31 = vld [vmem:[%s3167_s2 + $0x8] sm:$0xff] }
  0x9d   :  { %v230_v32 = vsel %vm187_vm0, %v218_v29, 0.0  ;;  %v242_v36 = vsel %vm187_vm0, %v222_v33, 0.0 }
  0xa0   :  { %207 = vadd.xlane.f32.xlu1 %v206_v20  ;;  %210 = vadd.xlane.f32.xlu0 %v209_v22 }
  0xa4   :  { %225 = vadd.xlane.f32.xlu1 %v224_v24  ;;  %228 = vadd.xlane.f32.xlu0 %v227_v26 }
  0xa8   :  { %237 = vadd.xlane.f32.xlu1 %v236_v28  ;;  %240 = vadd.xlane.f32.xlu0 %v239_v30  ;;  %v40_v30 = vld [vmem:[%s3167_s2] sm:$0xff] }
  0xac   :  { %231 = vadd.xlane.f32.xlu1 %v230_v32  ;;  %234 = vadd.xlane.f32.xlu0 %v233_v34 }
  0xb0   :  { %243 = vadd.xlane.f32.xlu1 %v242_v36  ;;  %246 = vadd.xlane.f32.xlu0 %v245_v37  ;;  %v42_v36 = vld [vmem:[%s3167_s2 + $0x10] sm:$0xff]  ;;  %v43_v37 = vld [vmem:[%s3167_s2 + $0x18] sm:$0xff] }
 0x11c   :  { %v193_v40 = vpop.xlane.xlu1 %192 }
 0x11d   :  { %v190_v38 = vpop.xlane.xlu0 %189 }
 0x121   :  { %v202_v39 = vpop.xlane.xlu0 %201 }
 0x122   :  { %v212_v48 = vadd.f32 %v202_v39, %v190_v38 }
 0x124   :  { %v252_v53 = vmul.f32 0.03125, %v212_v48 }
 0x125   :  { %v205_v41 = vpop.xlane.xlu0 %204 }
 0x126   :  { %v213_v49 = vadd.f32 %v205_v41, %v193_v40  ;;  %v260_v60 = vmul.f32 %v252_v53, %v252_v53 }
 0x128   :  { %v253_v54 = vmul.f32 0.03125, %v213_v49 }
 0x129   :  { %v196_v42 = vpop.xlane.xlu1 %195  ;;  %v199_v45 = vpop.xlane.xlu0 %198 }
 0x12a   :  { %v261_v63 = vmul.f32 %v253_v54, %v253_v54 }
 0x12d   :  { %v208_v46 = vpop.xlane.xlu1 %207  ;;  %v211_v47 = vpop.xlane.xlu0 %210 }
 0x12e   :  { %v214_v61 = vadd.f32 %v208_v46, %v196_v42  ;;  %v215_v0 = vadd.f32 %v211_v47, %v199_v45  ;;  %v1915_v42 = vld [vmem:[%s3167_s2 + $0x30] sm:$0xff]  ;;  %v1913_v47 = vld [vmem:[%s3167_s2 + $0x20] sm:$0xff] }
 0x130   :  { %v254_v6 = vmul.f32 0.03125, %v214_v61  ;;  %v255_v8 = vmul.f32 0.03125, %v215_v0 }
 0x131   :  { %v226_v50 = vpop.xlane.xlu1 %225  ;;  %v229_v52 = vpop.xlane.xlu0 %228 }
 0x132   :  { %v262_v20 = vmul.f32 %v254_v6, %v254_v6  ;;  %v263_v22 = vmul.f32 %v255_v8, %v255_v8 }
 0x135   :  { %v238_v55 = vpop.xlane.xlu1 %237  ;;  %v241_v57 = vpop.xlane.xlu0 %240 }
 0x136   :  { %v248_v56 = vadd.f32 %v238_v55, %v226_v50  ;;  %v249_v58 = vadd.f32 %v241_v57, %v229_v52  ;;  %v1914_v52 = vld [vmem:[%s3167_s2 + $0x28] sm:$0xff] }
 0x138   :  { %v256_v62 = vmul.f32 0.03125, %v248_v56  ;;  %v257_v1 = vmul.f32 0.03125, %v249_v58 }
 0x139   :  { %v232_v2 = vpop.xlane.xlu1 %231  ;;  %v235_v4 = vpop.xlane.xlu0 %234 }
 0x13a   :  { %v264_v3 = vsub.f32 %v256_v62, %v260_v60  ;;  %v265_v5 = vsub.f32 %v257_v1, %v261_v63 }
 0x13c   :  { %v268_v7 = vmax.f32 %v264_v3, 0.0  ;;  %v269_v9 = vmax.f32 %v265_v5, 0.0 }
 0x13d   :  { %v244_v10 = vpop.xlane.xlu1 %243  ;;  %v247_v15 = vpop.xlane.xlu0 %246 }
 0x13e   :  { %v272_v11 = vadd.f32 1e-05, %v268_v7  ;;  %v250_v12 = vadd.f32 %v244_v10, %v232_v2  ;;  %v273_v17 = vadd.f32 1e-05, %v269_v9  ;;  %v251_v18 = vadd.f32 %v247_v15, %v235_v4 }
 0x140   :  { %2342 = vrsqrt.f32 %v272_v11  ;;  %v258_v21 = vmul.f32 0.03125, %v250_v12  ;;  %v259_v23 = vmul.f32 0.03125, %v251_v18 }
 0x141   :  { %2344 = vrsqrt.f32 %v273_v17 }
 0x142   :  { %v266_v24 = vsub.f32 %v258_v21, %v262_v20  ;;  %v267_v25 = vsub.f32 %v259_v23, %v263_v22 }
 0x144   :  { %v270_v26 = vmax.f32 %v266_v24, 0.0  ;;  %v271_v27 = vmax.f32 %v267_v25, 0.0 }
 0x146   :  { %v274_v28 = vadd.f32 1e-05, %v270_v26  ;;  %v275_v29 = vadd.f32 1e-05, %v271_v27  ;;  %v374_v27 = vld [vmem:[%s3168_s3 + $0x8] sm:$0xff] }
 0x148   :  { %2346 = vrsqrt.f32 %v274_v28  ;;  %v375_v28 = vld [vmem:[%s3168_s3 + $0x10] sm:$0xff] }
 0x149   :  { %2348 = vrsqrt.f32 %v275_v29  ;;  %v376_v29 = vld [vmem:[%s3168_s3 + $0x18] sm:$0xff] }
 0x14a   :  { %v2343_v32 = vpop.eup %2342 }
 0x14b   :  { %v2345_v33 = vpop.eup %2344  ;;  %v280_v34 = vmul.f32 %v2343_v32, %v40_v30  ;;  %v377_v30 = vld [vmem:[%s3168_s3 + $0x20] sm:$0xff]  ;;  %v379_v32 = vld [vmem:[%s3168_s3 + $0x30] sm:$0xff] }
 0x14c   :  { %v281_v35 = vmul.f32 %v2345_v33, %v41_v31  ;;  %v378_v31 = vld [vmem:[%s3168_s3 + $0x28] sm:$0xff]  ;;  %v380_v33 = vld [vmem:[%s3168_s3 + $0x38] sm:$0xff] }
 0x14d   :  { %294 = vperm.xlu1 %2341, %v280_v34   ;;  %v284_v45 = vmul.f32 %v280_v34, %v252_v53  ;;  %v1916_v53 = vld [vmem:[%s3167_s2 + $0x38] sm:$0xff] }
 0x14e   :  { %299 = vperm.xlu0 %2340, %v281_v35   ;;  %v285_v50 = vmul.f32 %v281_v35, %v253_v54  ;;  %v373_v54 = vld [vmem:[%s3168_s3] sm:$0xff] }
 0x14f   :  { %v288_v49 = vsub.f32 %v1913_v47, %v284_v45  ;;  %2089 = vmatprep.mubr.msk.f32.mxu0 %vm381_vm1, %v373_v54  ;;  %2109 = vmatprep.mubr.msk.f32.mxu1 %vm381_vm1, %v373_v54 }
 0x150   :  { %v289_v55 = vsub.f32 %v1914_v52, %v285_v50 }
 0x152   :  { %v2347_v38 = vpop.eup %2346 }
 0x153   :  { %v2349_v39 = vpop.eup %2348  ;;  %v282_v40 = vmul.f32 %v2347_v38, %v42_v36 }
 0x154   :  { %v283_v41 = vmul.f32 %v2349_v39, %v43_v37 }
 0x155   :  { %304 = vperm.xlu0 %2340, %v282_v40   ;;  %v286_v46 = vmul.f32 %v282_v40, %v254_v6 }
 0x156   :  { %309 = vperm.xlu1 %2341, %v283_v41   ;;  %v287_v56 = vmul.f32 %v283_v41, %v255_v8 }
 0x157   :  { %v290_v48 = vsub.f32 %v1915_v42, %v286_v46 }
 0x158   :  { %v291_v57 = vsub.f32 %v1916_v53, %v287_v56 }
 0x159   :  { %332 = vperm.xlu0 %2340, %v290_v48  }
 0x15a   :  { %322 = vperm.xlu1 %2341, %v288_v49  }
 0x15e   :  { %327 = vperm.xlu1 %2341, %v289_v55  }
 0x162   :  { %337 = vperm.xlu1 %2341, %v291_v57  }
 0x1cc   :  { %v295_v58 = vpop.permute.xlu1 %294 }
 0x1cd   :  { %v300_v60 = vpop.permute.xlu0 %299  ;;  %v312_v0 = vmul.f32 %v295_v58, %v2495_v44  ;;  %v316_v1 = vmul.f32 %v295_v58, %v2497_v51 }
 0x1ce   :  { %v313_v2 = vmul.f32 %v300_v60, %v2493_v43  ;;  %v317_v3 = vmul.f32 %v300_v60, %v2503_v59 }
 0x1d4   :  { %v305_v62 = vpop.permute.xlu0 %304 }
 0x1d5   :  { %v310_v61 = vpop.permute.xlu1 %309  ;;  %v314_v7 = vmul.f32 %v305_v62, %v2511_v14  ;;  %v318_v8 = vmul.f32 %v305_v62, %v2513_v16 }
 0x1d6   :  { %v315_v12 = vmul.f32 %v310_v61, %v2509_v13  ;;  %v319_v44 = vmul.f32 %v310_v61, %v2519_v19 }
 0x1d8   :  { %v333_v6 = vpop.permute.xlu0 %332 }
 0x1d9   :  { %v323_v63 = vpop.permute.xlu1 %322  ;;  %v342_v15 = vadd.f32 %v333_v6, %v314_v7  ;;  %v346_v51 = vadd.f32 %v333_v6, %v318_v8 }
 0x1da   :  { %v340_v4 = vadd.f32 %v323_v63, %v312_v0  ;;  %v344_v5 = vadd.f32 %v323_v63, %v316_v1 }
 0x1db   :  { %v350_v24 = vmax.f32 %v342_v15, 0.0  ;;  %v354_v16 = vmax.f32 %v346_v51, 0.0 }
 0x1dc   :  { %v348_v17 = vmax.f32 %v340_v4, 0.0  ;;  %v352_v43 = vmax.f32 %v344_v5, 0.0 }
 0x1dd   :  { %v328_v9 = vpop.permute.xlu1 %327 }
 0x1de   :  { %v341_v10 = vadd.f32 %v328_v9, %v313_v2  ;;  %v345_v11 = vadd.f32 %v328_v9, %v317_v3 }
 0x1e0   :  { %v349_v18 = vmax.f32 %v341_v10, 0.0  ;;  %v353_v59 = vmax.f32 %v345_v11, 0.0 }
 0x1e1   :  { %v338_v20 = vpop.permute.xlu1 %337 }
 0x1e2   :  { %v343_v21 = vadd.f32 %v338_v20, %v315_v12  ;;  %v347_v22 = vadd.f32 %v338_v20, %v319_v44  ;;  %v2243_v23 = vpack.c.bf16 %v349_v18, %v348_v17  ;;  %v2251_v14 = vpack.c.bf16 %v353_v59, %v352_v43 }
 0x1e4   :  { %v351_v25 = vmax.f32 %v343_v21, 0.0  ;;  %v355_v26 = vmax.f32 %v347_v22, 0.0  ;;  %2244 = vmatprep.subr.bf16.mxu0 %v2243_v23  ;;  %2252 = vmatprep.subr.bf16.mxu1 %v2251_v14 }
 0x1e5   :  { %2246 = vmatpush3.bf16.msra.mxu0 %v2243_v23  ;;  %2254 = vmatpush3.bf16.msra.mxu1 %v2251_v14 }
 0x1e6   :  { %v2247_v13 = vpack.c.bf16 %v351_v25, %v350_v24  ;;  %v2255_v19 = vpack.c.bf16 %v355_v26, %v354_v16 }
 0x1e8   :  { %2248 = vmatprep.subr.bf16.mxu0 %v2247_v13  ;;  %2256 = vmatprep.subr.bf16.mxu1 %v2255_v19 }
 0x1e9   :  { %2250 = vmatpush3.bf16.msra.mxu0 %v2247_v13  ;;  %2258 = vmatpush3.bf16.msra.mxu1 %v2255_v19 }
 0x1ec   :  { %2090 = vmatmul.mubr.msk.f32.vlgmr.msra.gmra.mrb[0].mxu0 %vm381_vm1, %v374_v27  ;;  %2110 = vmatmul.mubr.msk.f32.vlgmr.msra.gmra.mrb[0].mxu1 %vm381_vm1, %v374_v27 }
 0x1ed   :  { %2092 = vmatprep.mubr.msk.f32.mxu0 %vm381_vm1, %v375_v28  ;;  %2112 = vmatprep.mubr.msk.f32.mxu1 %vm381_vm1, %v375_v28 }
 0x1f0   :  { %2093 = vmatmul.mubr.msk.f32.gmra.mrb[2].mxu0 %vm381_vm1, %v376_v29  ;;  %2113 = vmatmul.mubr.msk.f32.gmra.mrb[2].mxu1 %vm381_vm1, %v376_v29 }
 0x1f1   :  { %2095 = vmatprep.mubr.msk.f32.mxu0 %vm381_vm1, %v377_v30  ;;  %2115 = vmatprep.mubr.msk.f32.mxu1 %vm381_vm1, %v377_v30 }
 0x1f4   :  { %2096 = vmatmul.mubr.msk.f32.gmra.mrb[4].mxu0 %vm381_vm1, %v378_v31  ;;  %2116 = vmatmul.mubr.msk.f32.gmra.mrb[4].mxu1 %vm381_vm1, %v378_v31 }
 0x1f5   :  { %2098 = vmatprep.mubr.msk.f32.mxu0 %vm381_vm1, %v379_v32  ;;  %2118 = vmatprep.mubr.msk.f32.mxu1 %vm381_vm1, %v379_v32 }
 0x1f8   :  { %2099 = vmatmul.mubr.msk.f32.gmra.mrb[6].mxu0 %vm381_vm1, %v380_v33  ;;  %2119 = vmatmul.mubr.msk.f32.gmra.mrb[6].mxu1 %vm381_vm1, %v380_v33 }
 0x2bf   :  { %v2621_v34 = vpop.f32.mrb[0].mxu0  ;;  %v2623_v35 = vpop.f32.mrb[0].mxu1 }
 0x2c0   :  { %v2625_v36 = vpop.f32.mrb[1].mxu1  ;;  %v643_v37 = vsel %vm187_vm0, %v2623_v35, 0.0  ;;  %v619_v38 = vsel %vm187_vm0, %v2621_v34, 0.0  ;;  %v2631_v39 = vpop.f32.mrb[1].mxu0  ;;  %v673_v53 = vmul.f32 %v2621_v34, %v2621_v34  ;;  %v681_v63 = vmul.f32 %v2623_v35, %v2623_v35 }
 0x2c1   :  { %644 = vadd.xlane.f32.xlu0 %v643_v37  ;;  %620 = vadd.xlane.f32.xlu1 %v619_v38  ;;  %v672_v40 = vmul.f32 %v2631_v39, %v2631_v39  ;;  %v616_v41 = vsel %vm187_vm0, %v2631_v39, 0.0  ;;  %v680_v47 = vmul.f32 %v2625_v36, %v2625_v36  ;;  %v640_v56 = vsel %vm187_vm0, %v2625_v36, 0.0 }
 0x2c2   :  { %v691_v62 = vsel %vm187_vm0, %v673_v53, 0.0  ;;  %v715_v4 = vsel %vm187_vm0, %v681_v63, 0.0 }
 0x2c3   :  { %v688_v42 = vsel %vm187_vm0, %v672_v40, 0.0  ;;  %v2638_v45 = vpop.f32.mrb[2].mxu0  ;;  %v2640_v46 = vpop.f32.mrb[2].mxu1  ;;  %v712_v55 = vsel %vm187_vm0, %v680_v47, 0.0 }
 0x2c4   :  { %v2644_v48 = vpop.f32.mrb[3].mxu0  ;;  %v2646_v49 = vpop.f32.mrb[3].mxu1  ;;  %v625_v5 = vsel %vm187_vm0, %v2638_v45, 0.0  ;;  %v649_v8 = vsel %vm187_vm0, %v2640_v46, 0.0  ;;  %v675_v10 = vmul.f32 %v2638_v45, %v2638_v45  ;;  %v683_v44 = vmul.f32 %v2640_v46, %v2640_v46 }
 0x2c5   :  { %689 = vadd.xlane.f32.xlu1 %v688_v42  ;;  %617 = vadd.xlane.f32.xlu0 %v616_v41  ;;  %v622_v58 = vsel %vm187_vm0, %v2644_v48, 0.0  ;;  %v646_v2 = vsel %vm187_vm0, %v2646_v49, 0.0  ;;  %v674_v3 = vmul.f32 %v2644_v48, %v2644_v48  ;;  %v682_v7 = vmul.f32 %v2646_v49, %v2646_v49 }
 0x2c6   :  { %v697_v12 = vsel %vm187_vm0, %v675_v10, 0.0  ;;  %v721_v17 = vsel %vm187_vm0, %v683_v44, 0.0 }
 0x2c7   :  { %v2648_v50 = vpop.f32.mrb[4].mxu0  ;;  %v2650_v52 = vpop.f32.mrb[4].mxu1  ;;  %v694_v6 = vsel %vm187_vm0, %v674_v3, 0.0  ;;  %v718_v9 = vsel %vm187_vm0, %v682_v7, 0.0 }
 0x2c8   :  { %v2657_v57 = vpop.f32.mrb[5].mxu0  ;;  %v2659_v54 = vpop.f32.mrb[5].mxu1  ;;  %v631_v43 = vsel %vm187_vm0, %v2648_v50, 0.0  ;;  %v655_v20 = vsel %vm187_vm0, %v2650_v52, 0.0  ;;  %v677_v22 = vmul.f32 %v2648_v50, %v2648_v50  ;;  %v685_v24 = vmul.f32 %v2650_v52, %v2650_v52 }
 0x2c9   :  { %713 = vadd.xlane.f32.xlu1 %v712_v55  ;;  %641 = vadd.xlane.f32.xlu0 %v640_v56  ;;  %v628_v11 = vsel %vm187_vm0, %v2657_v57, 0.0  ;;  %v652_v15 = vsel %vm187_vm0, %v2659_v54, 0.0  ;;  %v676_v51 = vmul.f32 %v2657_v57, %v2657_v57  ;;  %v684_v59 = vmul.f32 %v2659_v54, %v2659_v54 }
 0x2ca   :  { %v703_v14 = vsel %vm187_vm0, %v677_v22, 0.0  ;;  %v727_v26 = vsel %vm187_vm0, %v685_v24, 0.0 }
 0x2cb   :  { %v2663_v60 = vpop.f32.mrb[6].mxu0  ;;  %v2665_v61 = vpop.f32.mrb[6].mxu1  ;;  %v700_v18 = vsel %vm187_vm0, %v676_v51, 0.0  ;;  %v724_v21 = vsel %vm187_vm0, %v684_v59, 0.0 }
 0x2cc   :  { %v2670_v0 = vpop.f32.mrb[7].mxu0  ;;  %v2672_v1 = vpop.f32.mrb[7].mxu1  ;;  %v637_v13 = vsel %vm187_vm0, %v2663_v60, 0.0  ;;  %v661_v28 = vsel %vm187_vm0, %v2665_v61, 0.0  ;;  %v679_v30 = vmul.f32 %v2663_v60, %v2663_v60  ;;  %v687_v32 = vmul.f32 %v2665_v61, %v2665_v61 }
 0x2cd   :  { %692 = vadd.xlane.f32.xlu0 %v691_v62  ;;  %623 = vadd.xlane.f32.xlu1 %v622_v58  ;;  %v634_v23 = vsel %vm187_vm0, %v2670_v0, 0.0  ;;  %v658_v16 = vsel %vm187_vm0, %v2672_v1, 0.0  ;;  %v678_v25 = vmul.f32 %v2670_v0, %v2670_v0  ;;  %v686_v27 = vmul.f32 %v2672_v1, %v2672_v1 }
 0x2ce   :  { %v709_v31 = vsel %vm187_vm0, %v679_v30, 0.0  ;;  %v733_v33 = vsel %vm187_vm0, %v687_v32, 0.0 }
 0x2cf   :  { %v706_v19 = vsel %vm187_vm0, %v678_v25, 0.0  ;;  %v730_v29 = vsel %vm187_vm0, %v686_v27, 0.0 }
 0x2d1   :  { %716 = vadd.xlane.f32.xlu0 %v715_v4  ;;  %647 = vadd.xlane.f32.xlu1 %v646_v2 }
 0x2d5   :  { %626 = vadd.xlane.f32.xlu0 %v625_v5  ;;  %695 = vadd.xlane.f32.xlu1 %v694_v6 }
 0x2d9   :  { %650 = vadd.xlane.f32.xlu0 %v649_v8  ;;  %719 = vadd.xlane.f32.xlu1 %v718_v9 }
 0x2dd   :  { %698 = vadd.xlane.f32.xlu0 %v697_v12  ;;  %629 = vadd.xlane.f32.xlu1 %v628_v11 }
 0x2e1   :  { %722 = vadd.xlane.f32.xlu0 %v721_v17  ;;  %653 = vadd.xlane.f32.xlu1 %v652_v15 }
 0x2e5   :  { %632 = vadd.xlane.f32.xlu0 %v631_v43  ;;  %701 = vadd.xlane.f32.xlu1 %v700_v18 }
 0x2e9   :  { %656 = vadd.xlane.f32.xlu0 %v655_v20  ;;  %725 = vadd.xlane.f32.xlu1 %v724_v21 }
 0x2ed   :  { %704 = vadd.xlane.f32.xlu0 %v703_v14  ;;  %635 = vadd.xlane.f32.xlu1 %v634_v23 }
 0x2f1   :  { %728 = vadd.xlane.f32.xlu0 %v727_v26  ;;  %659 = vadd.xlane.f32.xlu1 %v658_v16  ;;  %v356_v26 = vld [vmem:[%s3169_s4] sm:$0xff] }
 0x2f5   :  { %638 = vadd.xlane.f32.xlu0 %v637_v13  ;;  %707 = vadd.xlane.f32.xlu1 %v706_v19 }
 0x2f9   :  { %662 = vadd.xlane.f32.xlu0 %v661_v28  ;;  %731 = vadd.xlane.f32.xlu1 %v730_v29 }
 0x2fd   :  { %710 = vadd.xlane.f32.xlu0 %v709_v31 }
 0x301   :  { %734 = vadd.xlane.f32.xlu0 %v733_v33 }
 0x34e   :  { %v645_v37 = vpop.xlane.xlu0 %644  ;;  %v621_v38 = vpop.xlane.xlu1 %620 }
 0x34f   :  { %v665_v53 = vadd.f32 %v645_v37, %v621_v38 }
 0x351   :  { %v745_v4 = vmul.f32 0.03125, %v665_v53 }
 0x352   :  { %v690_v40 = vpop.xlane.xlu1 %689  ;;  %v618_v41 = vpop.xlane.xlu0 %617 }
 0x353   :  { %v761_v10 = vmul.f32 %v745_v4, %v745_v4 }
 0x356   :  { %v714_v42 = vpop.xlane.xlu1 %713  ;;  %v642_v47 = vpop.xlane.xlu0 %641 }
 0x357   :  { %v736_v55 = vadd.f32 %v714_v42, %v690_v40  ;;  %v664_v56 = vadd.f32 %v642_v47, %v618_v41  ;;  %v357_v41 = vld [vmem:[%s3169_s4 + $0x8] sm:$0xff] }
 0x359   :  { %v2733_v58 = vmul.f32 0.03125, %v664_v56  ;;  %v752_v2 = vmul.f32 0.03125, %v736_v55 }
 0x35a   :  { %v693_v62 = vpop.xlane.xlu0 %692  ;;  %v624_v63 = vpop.xlane.xlu1 %623 }
 0x35b   :  { %v760_v3 = vmul.f32 %v2733_v58, %v2733_v58 }
 0x35d   :  { %v768_v5 = vsub.f32 %v752_v2, %v760_v3  ;;  %v1926_v2 = vld [vmem:[%s3169_s4 + $0x48] sm:$0xff] }
 0x35e   :  { %v717_v6 = vpop.xlane.xlu0 %716  ;;  %v648_v7 = vpop.xlane.xlu1 %647 }
 0x35f   :  { %v776_v8 = vmax.f32 %v768_v5, 0.0  ;;  %v737_v9 = vadd.f32 %v717_v6, %v693_v62  ;;  %v666_v44 = vadd.f32 %v648_v7, %v624_v63 }
 0x361   :  { %v784_v11 = vadd.f32 1e-05, %v776_v8  ;;  %v753_v12 = vmul.f32 0.03125, %v737_v9  ;;  %v746_v18 = vmul.f32 0.03125, %v666_v44  ;;  %v358_v44 = vld [vmem:[%s3169_s4 + $0x10] sm:$0xff] }
 0x362   :  { %v627_v15 = vpop.xlane.xlu0 %626  ;;  %v696_v51 = vpop.xlane.xlu1 %695 }
 0x363   :  { %2350 = vrsqrt.f32 %v784_v11  ;;  %v769_v17 = vsub.f32 %v753_v12, %v761_v10  ;;  %v762_v23 = vmul.f32 %v746_v18, %v746_v18 }
 0x365   :  { %v777_v43 = vmax.f32 %v769_v17, 0.0 }
 0x366   :  { %v651_v59 = vpop.xlane.xlu0 %650  ;;  %v720_v20 = vpop.xlane.xlu1 %719 }
 0x367   :  { %v785_v21 = vadd.f32 1e-05, %v777_v43  ;;  %v738_v22 = vadd.f32 %v720_v20, %v696_v51  ;;  %v667_v14 = vadd.f32 %v651_v59, %v627_v15 }
 0x369   :  { %2352 = vrsqrt.f32 %v785_v21  ;;  %v754_v24 = vmul.f32 0.03125, %v738_v22  ;;  %v2740_v27 = vmul.f32 0.03125, %v667_v14  ;;  %v1927_v21 = vld [vmem:[%s3169_s4 + $0x50] sm:$0xff] }
 0x36a   :  { %v699_v16 = vpop.xlane.xlu0 %698  ;;  %v630_v25 = vpop.xlane.xlu1 %629 }
 0x36b   :  { %v770_v13 = vsub.f32 %v754_v24, %v762_v23  ;;  %v763_v37 = vmul.f32 %v2740_v27, %v2740_v27 }
 0x36d   :  { %v2351_v19 = vpop.eup %2350  ;;  %v778_v28 = vmax.f32 %v770_v13, 0.0 }
 0x36e   :  { %v800_v29 = vmul.f32 %v2351_v19, %v356_v26  ;;  %v723_v30 = vpop.xlane.xlu0 %722  ;;  %v654_v31 = vpop.xlane.xlu1 %653 }
 0x36f   :  { %v786_v32 = vadd.f32 1e-05, %v778_v28  ;;  %v739_v33 = vadd.f32 %v723_v30, %v699_v16  ;;  %v668_v40 = vadd.f32 %v654_v31, %v630_v25  ;;  %v359_v28 = vld [vmem:[%s3169_s4 + $0x18] sm:$0xff] }
 0x370   :  { %826 = vperm.xlu1 %2341, %v800_v29  }
 0x371   :  { %2354 = vrsqrt.f32 %v786_v32  ;;  %v755_v38 = vmul.f32 0.03125, %v739_v33  ;;  %v2747_v63 = vmul.f32 0.03125, %v668_v40 }
 0x372   :  { %v633_v42 = vpop.xlane.xlu0 %632  ;;  %v702_v47 = vpop.xlane.xlu1 %701 }
 0x373   :  { %v2353_v55 = vpop.eup %2352  ;;  %v771_v56 = vsub.f32 %v755_v38, %v763_v37  ;;  %v764_v10 = vmul.f32 %v2747_v63, %v2747_v63 }
 0x374   :  { %v801_v53 = vmul.f32 %v2353_v55, %v357_v41  ;;  %v1925_v41 = vld [vmem:[%s3169_s4 + $0x40] sm:$0xff] }
 0x375   :  { %v779_v62 = vmax.f32 %v771_v56, 0.0 }
 0x376   :  { %v657_v3 = vpop.xlane.xlu0 %656  ;;  %v726_v5 = vpop.xlane.xlu1 %725  ;;  %831 = vperm.xlu0 %2340, %v801_v53   ;;  %v809_v6 = vmul.f32 %v801_v53, %v745_v4 }
 0x377   :  { %v787_v7 = vadd.f32 1e-05, %v779_v62  ;;  %v740_v8 = vadd.f32 %v726_v5, %v702_v47  ;;  %v669_v11 = vadd.f32 %v657_v3, %v633_v42 }
 0x378   :  { %v817_v9 = vsub.f32 %v1926_v2, %v809_v6 }
 0x379   :  { %2356 = vrsqrt.f32 %v787_v7  ;;  %v756_v12 = vmul.f32 0.03125, %v740_v8  ;;  %v2757_v4 = vmul.f32 0.03125, %v669_v11 }
 0x37a   :  { %v705_v15 = vpop.xlane.xlu0 %704  ;;  %887 = vperm.xlu1 %2341, %v817_v9   ;;  %v636_v51 = vpop.xlane.xlu1 %635 }
 0x37b   :  { %v2355_v17 = vpop.eup %2354  ;;  %v772_v43 = vsub.f32 %v756_v12, %v764_v10  ;;  %v765_v26 = vmul.f32 %v2757_v4, %v2757_v4  ;;  %v1929_v12 = vld [vmem:[%s3169_s4 + $0x60] sm:$0xff] }
 0x37c   :  { %v802_v59 = vmul.f32 %v2355_v17, %v358_v44 }
 0x37d   :  { %v780_v20 = vmax.f32 %v772_v43, 0.0 }
 0x37e   :  { %v729_v22 = vpop.xlane.xlu0 %728  ;;  %836 = vperm.xlu0 %2340, %v802_v59   ;;  %v660_v23 = vpop.xlane.xlu1 %659  ;;  %v810_v14 = vmul.f32 %v802_v59, %v746_v18  ;;  %v808_v18 = vmul.f32 %v800_v29, %v2733_v58  ;;  %v360_v58 = vld [vmem:[%s3169_s4 + $0x20] sm:$0xff]  ;;  %v1928_v29 = vld [vmem:[%s3169_s4 + $0x58] sm:$0xff] }
 0x37f   :  { %v788_v24 = vadd.f32 1e-05, %v780_v20  ;;  %v741_v16 = vadd.f32 %v729_v22, %v705_v15  ;;  %v670_v19 = vadd.f32 %v660_v23, %v636_v51 }
 0x380   :  { %v818_v25 = vsub.f32 %v1927_v21, %v810_v14  ;;  %v816_v53 = vsub.f32 %v1925_v41, %v808_v18  ;;  %v361_v21 = vld [vmem:[%s3169_s4 + $0x28] sm:$0xff] }
 0x381   :  { %2358 = vrsqrt.f32 %v788_v24  ;;  %v757_v13 = vmul.f32 0.03125, %v741_v16  ;;  %v750_v40 = vmul.f32 0.03125, %v670_v19  ;;  %v1930_v16 = vld [vmem:[%s3169_s4 + $0x68] sm:$0xff] }
 0x382   :  { %892 = vperm.xlu0 %2340, %v818_v25   ;;  %v639_v30 = vpop.xlane.xlu0 %638  ;;  %v708_v31 = vpop.xlane.xlu1 %707 }
 0x383   :  { %v2357_v32 = vpop.eup %2356  ;;  %v773_v33 = vsub.f32 %v757_v13, %v765_v26  ;;  %v766_v2 = vmul.f32 %v750_v40, %v750_v40  ;;  %v362_v13 = vld [vmem:[%s3169_s4 + $0x30] sm:$0xff] }
 0x384   :  { %v803_v37 = vmul.f32 %v2357_v32, %v359_v28 }
 0x385   :  { %v781_v38 = vmax.f32 %v773_v33, 0.0 }
 0x386   :  { %v663_v42 = vpop.xlane.xlu0 %662  ;;  %841 = vperm.xlu1 %2341, %v803_v37   ;;  %v732_v47 = vpop.xlane.xlu1 %731  ;;  %v811_v62 = vmul.f32 %v803_v37, %v2740_v27  ;;  %v1932_v37 = vld [vmem:[%s3169_s4 + $0x78] sm:$0xff] }
 0x387   :  { %v789_v55 = vadd.f32 1e-05, %v781_v38  ;;  %v742_v56 = vadd.f32 %v732_v47, %v708_v31  ;;  %v671_v3 = vadd.f32 %v663_v42, %v639_v30  ;;  %v1931_v30 = vld [vmem:[%s3169_s4 + $0x70] sm:$0xff] }
 0x388   :  { %v819_v10 = vsub.f32 %v1928_v29, %v811_v62 }
 0x389   :  { %2360 = vrsqrt.f32 %v789_v55  ;;  %v758_v5 = vmul.f32 0.03125, %v742_v56  ;;  %v751_v11 = vmul.f32 0.03125, %v671_v3 }
 0x38a   :  { %v711_v6 = vpop.xlane.xlu0 %710  ;;  %882 = vperm.xlu1 %2341, %v816_v53  }
 0x38b   :  { %v2359_v7 = vpop.eup %2358  ;;  %v774_v8 = vsub.f32 %v758_v5, %v766_v2  ;;  %v767_v59 = vmul.f32 %v751_v11, %v751_v11 }
 0x38c   :  { %v804_v9 = vmul.f32 %v2359_v7, %v360_v58 }
 0x38d   :  { %v782_v27 = vmax.f32 %v774_v8, 0.0 }
 0x38e   :  { %846 = vperm.xlu0 %2340, %v804_v9   ;;  %v735_v44 = vpop.xlane.xlu0 %734  ;;  %897 = vperm.xlu1 %2341, %v819_v10   ;;  %v812_v15 = vmul.f32 %v804_v9, %v2747_v63 }
 0x38f   :  { %v790_v51 = vadd.f32 1e-05, %v782_v27  ;;  %v743_v17 = vadd.f32 %v735_v44, %v711_v6 }
 0x390   :  { %v820_v43 = vsub.f32 %v1929_v12, %v812_v15 }
 0x391   :  { %2362 = vrsqrt.f32 %v790_v51  ;;  %v759_v20 = vmul.f32 0.03125, %v743_v17 }
 0x392   :  { %902 = vperm.xlu0 %2340, %v820_v43  }
 0x393   :  { %v2361_v22 = vpop.eup %2360  ;;  %v775_v23 = vsub.f32 %v759_v20, %v767_v59 }
 0x394   :  { %v805_v14 = vmul.f32 %v2361_v22, %v361_v21 }
 0x395   :  { %v783_v24 = vmax.f32 %v775_v23, 0.0 }
 0x396   :  { %851 = vperm.xlu1 %2341, %v805_v14   ;;  %v813_v63 = vmul.f32 %v805_v14, %v2757_v4  ;;  %v363_v4 = vld [vmem:[%s3169_s4 + $0x38] sm:$0xff] }
 0x397   :  { %v791_v25 = vadd.f32 1e-05, %v783_v24 }
 0x398   :  { %v821_v26 = vsub.f32 %v1930_v16, %v813_v63 }
 0x399   :  { %2364 = vrsqrt.f32 %v791_v25 }
 0x39a   :  { %907 = vperm.xlu1 %2341, %v821_v26  }
 0x39b   :  { %v2363_v19 = vpop.eup %2362 }
 0x39c   :  { %v806_v28 = vmul.f32 %v2363_v19, %v362_v13 }
 0x39e   :  { %856 = vperm.xlu0 %2340, %v806_v28   ;;  %v814_v31 = vmul.f32 %v806_v28, %v750_v40 }
 0x3a0   :  { %v822_v32 = vsub.f32 %v1931_v30, %v814_v31 }
 0x3a2   :  { %912 = vperm.xlu0 %2340, %v822_v32  }
 0x3a3   :  { %v2365_v33 = vpop.eup %2364 }
 0x3a4   :  { %v807_v18 = vmul.f32 %v2365_v33, %v363_v4 }
 0x3a6   :  { %861 = vperm.xlu1 %2341, %v807_v18   ;;  %v815_v38 = vmul.f32 %v807_v18, %v751_v11 }
 0x3a8   :  { %v823_v41 = vsub.f32 %v1932_v37, %v815_v38 }
 0x3aa   :  { %917 = vperm.xlu1 %2341, %v823_v41  }
 0x3ef   :  { %v827_v42 = vpop.permute.xlu1 %826 }
 0x3f0   :  { %v864_v12 = vmul.f32 %v827_v42, %v2631_v39  ;;  %v872_v44 = vmul.f32 %v827_v42, %v2625_v36 }
 0x3f5   :  { %v832_v47 = vpop.permute.xlu0 %831 }
 0x3f6   :  { %v865_v40 = vmul.f32 %v2621_v34, %v832_v47  ;;  %v873_v55 = vmul.f32 %v2623_v35, %v832_v47 }
 0x3f9   :  { %v888_v56 = vpop.permute.xlu1 %887 }
 0x3fa   :  { %v921_v53 = vadd.f32 %v888_v56, %v865_v40  ;;  %v929_v62 = vadd.f32 %v888_v56, %v873_v55 }
 0x3fc   :  { %v937_v2 = vmax.f32 %v921_v53, 0.0  ;;  %v945_v3 = vmax.f32 %v929_v62, 0.0 }
 0x3fd   :  { %v837_v5 = vpop.permute.xlu0 %836 }
 0x3fe   :  { %v979_v58 = vsel %vm187_vm0, %v945_v3, -inf  ;;  %v955_v29 = vsel %vm187_vm0, %v937_v2, -inf  ;;  %v866_v6 = vmul.f32 %v837_v5, %v2644_v48  ;;  %v874_v7 = vmul.f32 %v837_v5, %v2646_v49 }
 0x3ff   :  { %980 = vmax.xlane.f32.xlu0 %v979_v58  ;;  %956 = vmax.xlane.f32.xlu1 %v955_v29 }
 0x401   :  { %v893_v8 = vpop.permute.xlu0 %892 }
 0x402   :  { %v922_v34 = vadd.f32 %v893_v8, %v866_v6  ;;  %v930_v9 = vadd.f32 %v893_v8, %v874_v7 }
 0x404   :  { %v938_v35 = vmax.f32 %v922_v34, 0.0  ;;  %v946_v11 = vmax.f32 %v930_v9, 0.0 }
 0x405   :  { %v842_v10 = vpop.permute.xlu1 %841 }
 0x406   :  { %v958_v27 = vsel %vm187_vm0, %v938_v35, -inf  ;;  %v982_v17 = vsel %vm187_vm0, %v946_v11, -inf  ;;  %v867_v43 = vmul.f32 %v2638_v45, %v842_v10  ;;  %v875_v36 = vmul.f32 %v2640_v46, %v842_v10 }
 0x407   :  { %959 = vmax.xlane.f32.xlu1 %v958_v27 }
 0x409   :  { %v883_v15 = vpop.permute.xlu1 %882 }
 0x40a   :  { %v920_v51 = vadd.f32 %v883_v15, %v864_v12  ;;  %v928_v48 = vadd.f32 %v883_v15, %v872_v44 }
 0x40b   :  { %983 = vmax.xlane.f32.xlu1 %v982_v17 }
 0x40c   :  { %v936_v49 = vmax.f32 %v920_v51, 0.0  ;;  %v944_v21 = vmax.f32 %v928_v48, 0.0 }
 0x40d   :  { %v847_v59 = vpop.permute.xlu0 %846  ;;  %v898_v20 = vpop.permute.xlu1 %897 }
 0x40e   :  { %v923_v22 = vadd.f32 %v898_v20, %v867_v43  ;;  %v952_v23 = vsel %vm187_vm0, %v936_v49, -inf  ;;  %v868_v14 = vmul.f32 %v847_v59, %v2657_v57  ;;  %v876_v39 = vmul.f32 %v847_v59, %v2659_v54 }
 0x40f   :  { %953 = vmax.xlane.f32.xlu0 %v952_v23  ;;  %v931_v25 = vadd.f32 %v898_v20, %v875_v36  ;;  %v976_v45 = vsel %vm187_vm0, %v944_v21, -inf }
 0x410   :  { %v939_v26 = vmax.f32 %v923_v22, 0.0 }
 0x411   :  { %v903_v24 = vpop.permute.xlu0 %902  ;;  %v947_v31 = vmax.f32 %v931_v25, 0.0  ;;  %v1018_v25 = vld [vmem:[%s3170_s5 + $0x8] sm:$0xff] }
 0x412   :  { %v924_v16 = vadd.f32 %v903_v24, %v868_v14  ;;  %v932_v63 = vadd.f32 %v903_v24, %v876_v39  ;;  %v961_v57 = vsel %vm187_vm0, %v939_v26, -inf }
 0x413   :  { %977 = vmax.xlane.f32.xlu0 %v976_v45  ;;  %v985_v37 = vsel %vm187_vm0, %v947_v31, -inf  ;;  %v1019_v45 = vld [vmem:[%s3170_s5 + $0x10] sm:$0xff]  ;;  %v1024_v31 = vld [vmem:[%s3170_s5 + $0x38] sm:$0xff] }
 0x414   :  { %v940_v13 = vmax.f32 %v924_v16, 0.0  ;;  %v948_v28 = vmax.f32 %v932_v63, 0.0 }
 0x415   :  { %v852_v19 = vpop.permute.xlu1 %851 }
 0x416   :  { %v964_v30 = vsel %vm187_vm0, %v940_v13, -inf  ;;  %v869_v54 = vmul.f32 %v2648_v50, %v852_v19  ;;  %v877_v46 = vmul.f32 %v2650_v52, %v852_v19  ;;  %v988_v33 = vsel %vm187_vm0, %v948_v28, -inf  ;;  %v1020_v13 = vld [vmem:[%s3170_s5 + $0x18] sm:$0xff]  ;;  %v1021_v19 = vld [vmem:[%s3170_s5 + $0x20] sm:$0xff]  ;;  %v1022_v28 = vld [vmem:[%s3170_s5 + $0x28] sm:$0xff] }
 0x417   :  { %965 = vmax.xlane.f32.xlu1 %v964_v30  ;;  %962 = vmax.xlane.f32.xlu0 %v961_v57  ;;  %v1023_v30 = vld [vmem:[%s3170_s5 + $0x30] sm:$0xff]  ;;  %v1461_v57 = vld [vmem:[%s3171_s7] sm:$0xff] }
 0x419   :  { %v908_v32 = vpop.permute.xlu1 %907 }
 0x41a   :  { %v925_v4 = vadd.f32 %v908_v32, %v869_v54  ;;  %v933_v18 = vadd.f32 %v908_v32, %v877_v46 }
 0x41b   :  { %989 = vmax.xlane.f32.xlu1 %v988_v33  ;;  %986 = vmax.xlane.f32.xlu0 %v985_v37 }
 0x41c   :  { %v941_v38 = vmax.f32 %v925_v4, 0.0  ;;  %v949_v47 = vmax.f32 %v933_v18, 0.0 }
 0x41d   :  { %v857_v41 = vpop.permute.xlu0 %856 }
 0x41e   :  { %v967_v42 = vsel %vm187_vm0, %v941_v38, -inf  ;;  %v870_v40 = vmul.f32 %v857_v41, %v2670_v0  ;;  %v878_v50 = vmul.f32 %v857_v41, %v2672_v1  ;;  %v991_v53 = vsel %vm187_vm0, %v949_v47, -inf }
 0x41f   :  { %968 = vmax.xlane.f32.xlu0 %v967_v42 }
 0x421   :  { %v913_v52 = vpop.permute.xlu0 %912 }
 0x422   :  { %v926_v55 = vadd.f32 %v913_v52, %v870_v40  ;;  %v934_v56 = vadd.f32 %v913_v52, %v878_v50 }
 0x423   :  { %992 = vmax.xlane.f32.xlu0 %v991_v53 }
 0x424   :  { %v942_v62 = vmax.f32 %v926_v55, 0.0  ;;  %v950_v3 = vmax.f32 %v934_v56, 0.0 }
 0x425   :  { %v862_v2 = vpop.permute.xlu1 %861 }
 0x426   :  { %v970_v5 = vsel %vm187_vm0, %v942_v62, -inf  ;;  %v871_v58 = vmul.f32 %v2663_v60, %v862_v2  ;;  %v879_v29 = vmul.f32 %v2665_v61, %v862_v2  ;;  %v994_v7 = vsel %vm187_vm0, %v950_v3, -inf  ;;  %v1017_v60 = vld [vmem:[%s3170_s5] sm:$0xff] }
 0x427   :  { %971 = vmax.xlane.f32.xlu1 %v970_v5  ;;  %2137 = vmatprep.mubr.msk.f32.mxu0 %vm1025_vm2, %v1017_v60 }
 0x428   :  { %2165 = vmatprep.mubr.msk.f32.mxu1 %vm1025_vm2, %v1017_v60 }
 0x429   :  { %v918_v0 = vpop.permute.xlu1 %917 }
 0x42a   :  { %v927_v6 = vadd.f32 %v918_v0, %v871_v58  ;;  %v935_v1 = vadd.f32 %v918_v0, %v879_v29 }
 0x42b   :  { %995 = vmax.xlane.f32.xlu1 %v994_v7 }
 0x42c   :  { %v943_v8 = vmax.f32 %v927_v6, 0.0  ;;  %v951_v34 = vmax.f32 %v935_v1, 0.0 }
 0x42e   :  { %v973_v9 = vsel %vm187_vm0, %v943_v8, -inf  ;;  %v997_v35 = vsel %vm187_vm0, %v951_v34, -inf }
 0x42f   :  { %974 = vmax.xlane.f32.xlu0 %v973_v9 }
 0x433   :  { %998 = vmax.xlane.f32.xlu0 %v997_v35 }
 0x48c   :  { %v981_v61 = vpop.xlane.xlu0 %980  ;;  %v957_v10 = vpop.xlane.xlu1 %956 }
 0x494   :  { %v960_v12 = vpop.xlane.xlu1 %959 }
 0x498   :  { %v984_v48 = vpop.xlane.xlu1 %983 }
 0x49c   :  { %v954_v11 = vpop.xlane.xlu0 %953 }
 0x49d   :  { %v2259_v27 = vpack.c.bf16 %v957_v10, %v954_v11 }
 0x49f   :  { %2260 = vmatprep.subr.bf16.mxu0 %v2259_v27 }
 0x4a0   :  { %v978_v44 = vpop.xlane.xlu0 %977  ;;  %2262 = vmatpush3.bf16.msra.mxu0 %v2259_v27 }
 0x4a1   :  { %v2275_v15 = vpack.c.bf16 %v981_v61, %v978_v44 }
 0x4a3   :  { %2276 = vmatprep.subr.bf16.mxu1 %v2275_v15 }
 0x4a4   :  { %2278 = vmatpush3.bf16.msra.mxu1 %v2275_v15  ;;  %v963_v51 = vpop.xlane.xlu0 %962  ;;  %v966_v59 = vpop.xlane.xlu1 %965 }
 0x4a5   :  { %v2263_v17 = vpack.c.bf16 %v963_v51, %v960_v12 }
 0x4a7   :  { %2264 = vmatprep.subr.bf16.mxu0 %v2263_v17 }
 0x4a8   :  { %v987_v49 = vpop.xlane.xlu0 %986  ;;  %2266 = vmatpush3.bf16.msra.mxu0 %v2263_v17  ;;  %v990_v22 = vpop.xlane.xlu1 %989 }
 0x4a9   :  { %v2279_v43 = vpack.c.bf16 %v987_v49, %v984_v48 }
 0x4ab   :  { %2280 = vmatprep.subr.bf16.mxu1 %v2279_v43 }
 0x4ac   :  { %v969_v20 = vpop.xlane.xlu0 %968  ;;  %2282 = vmatpush3.bf16.msra.mxu1 %v2279_v43 }
 0x4ad   :  { %v2267_v21 = vpack.c.bf16 %v969_v20, %v966_v59 }
 0x4af   :  { %2268 = vmatprep.subr.bf16.mxu0 %v2267_v21 }
 0x4b0   :  { %v993_v23 = vpop.xlane.xlu0 %992  ;;  %2270 = vmatpush3.bf16.msra.mxu0 %v2267_v21 }
 0x4b1   :  { %v2283_v14 = vpack.c.bf16 %v993_v23, %v990_v22 }
 0x4b3   :  { %2284 = vmatprep.subr.bf16.mxu1 %v2283_v14 }
 0x4b4   :  { %2286 = vmatpush3.bf16.msra.mxu1 %v2283_v14  ;;  %v972_v39 = vpop.xlane.xlu1 %971 }
 0x4b8   :  { %v996_v16 = vpop.xlane.xlu1 %995 }
 0x4bc   :  { %v975_v36 = vpop.xlane.xlu0 %974 }
 0x4bd   :  { %v2271_v24 = vpack.c.bf16 %v975_v36, %v972_v39 }
 0x4bf   :  { %2272 = vmatprep.subr.bf16.mxu0 %v2271_v24 }
 0x4c0   :  { %v999_v63 = vpop.xlane.xlu0 %998  ;;  %2274 = vmatpush3.bf16.msra.mxu0 %v2271_v24 }
 0x4c1   :  { %v2287_v26 = vpack.c.bf16 %v999_v63, %v996_v16 }
 0x4c3   :  { %2288 = vmatprep.subr.bf16.mxu1 %v2287_v26  ;;  %2138 = vmatmul.mubr.msk.f32.vlgmr.msra.gmra.mrb[8].mxu0 %vm1025_vm2, %v1018_v25 }
 0x4c4   :  { %2290 = vmatpush3.bf16.msra.mxu1 %v2287_v26  ;;  %2140 = vmatprep.mubr.msk.f32.mxu0 %vm1025_vm2, %v1019_v45 }
 0x4c7   :  { %2166 = vmatmul.mubr.msk.f32.vlgmr.msra.gmra.mrb[8].mxu1 %vm1025_vm2, %v1018_v25  ;;  %2141 = vmatmul.mubr.msk.f32.gmra.mrb[10].mxu0 %vm1025_vm2, %v1020_v13 }
 0x4c8   :  { %2168 = vmatprep.mubr.msk.f32.mxu1 %vm1025_vm2, %v1019_v45  ;;  %2143 = vmatprep.mubr.msk.f32.mxu0 %vm1025_vm2, %v1021_v19 }
 0x4cb   :  { %2169 = vmatmul.mubr.msk.f32.gmra.mrb[10].mxu1 %vm1025_vm2, %v1020_v13  ;;  %2144 = vmatmul.mubr.msk.f32.gmra.mrb[12].mxu0 %vm1025_vm2, %v1022_v28 }
 0x4cc   :  { %2171 = vmatprep.mubr.msk.f32.mxu1 %vm1025_vm2, %v1021_v19  ;;  %2146 = vmatprep.mubr.msk.f32.mxu0 %vm1025_vm2, %v1023_v30 }
 0x4cf   :  { %2172 = vmatmul.mubr.msk.f32.gmra.mrb[12].mxu1 %vm1025_vm2, %v1022_v28  ;;  %2147 = vmatmul.mubr.msk.f32.gmra.mrb[14].mxu0 %vm1025_vm2, %v1024_v31 }
 0x4d0   :  { %2174 = vmatprep.mubr.msk.f32.mxu1 %vm1025_vm2, %v1023_v30  ;;  %2193 = vmatprep.mubr.msk.f32.mxu0 %vm1025_vm2, %v1461_v57 }
 0x4d3   :  { %2175 = vmatmul.mubr.msk.f32.gmra.mrb[14].mxu1 %vm1025_vm2, %v1024_v31 }
 0x4d4   :  { %2215 = vmatprep.mubr.msk.f32.mxu1 %vm1025_vm2, %v1461_v57 }
 0x596   :  { %v2878_v54 = vpop.f32.mrb[8].mxu0 }
 0x597   :  { %v2880_v46 = vpop.f32.mrb[9].mxu0  ;;  %v1285_v32 = vmul.f32 %v2878_v54, %v2878_v54 }
 0x598   :  { %v1284_v4 = vmul.f32 %v2880_v46, %v2880_v46 }
 0x59a   :  { %v2886_v33 = vpop.f32.mrb[8].mxu1  ;;  %v2888_v18 = vpop.f32.mrb[10].mxu0 }
 0x59b   :  { %v1277_v37 = vadd.f32 %v2886_v33, %v2878_v54  ;;  %v1293_v38 = vmul.f32 %v2886_v33, %v2886_v33  ;;  %v2894_v41 = vpop.f32.mrb[9].mxu1  ;;  %v2896_v42 = vpop.f32.mrb[11].mxu0  ;;  %v1287_v55 = vmul.f32 %v2888_v18, %v2888_v18 }
 0x59c   :  { %v1276_v47 = vadd.f32 %v2894_v41, %v2880_v46  ;;  %v1292_v40 = vmul.f32 %v2894_v41, %v2894_v41  ;;  %v1286_v62 = vmul.f32 %v2896_v42, %v2896_v42 }
 0x59d   :  { %v1317_v50 = vadd.f32 %v1293_v38, %v1285_v32  ;;  %v2902_v52 = vmul.f32 0.5, %v1277_v37 }
 0x59e   :  { %v1316_v56 = vadd.f32 %v1292_v40, %v1284_v4  ;;  %v2906_v53 = vmul.f32 0.5, %v1276_v47  ;;  %v2910_v2 = vpop.f32.mrb[10].mxu1  ;;  %v2912_v3 = vpop.f32.mrb[12].mxu0 }
 0x59f   :  { %v1333_v5 = vmul.f32 0.5, %v1317_v50  ;;  %v1341_v58 = vmul.f32 %v2902_v52, %v2902_v52  ;;  %v1279_v29 = vadd.f32 %v2910_v2, %v2888_v18  ;;  %v1295_v0 = vmul.f32 %v2910_v2, %v2910_v2  ;;  %v2920_v6 = vpop.f32.mrb[11].mxu1  ;;  %v2922_v1 = vpop.f32.mrb[13].mxu0 }
 0x5a0   :  { %v1332_v7 = vmul.f32 0.5, %v1316_v56  ;;  %v1340_v8 = vmul.f32 %v2906_v53, %v2906_v53  ;;  %v1278_v34 = vadd.f32 %v2920_v6, %v2896_v42  ;;  %v1294_v9 = vmul.f32 %v2920_v6, %v2920_v6 }
 0x5a1   :  { %v1349_v35 = vsub.f32 %v1333_v5, %v1341_v58  ;;  %v1319_v60 = vadd.f32 %v1295_v0, %v1287_v55  ;;  %v2930_v61 = vmul.f32 0.5, %v1279_v29  ;;  %v1289_v10 = vmul.f32 %v2912_v3, %v2912_v3 }
 0x5a2   :  { %v1348_v11 = vsub.f32 %v1332_v7, %v1340_v8  ;;  %v1318_v27 = vadd.f32 %v1294_v9, %v1286_v62  ;;  %v2934_v12 = vmul.f32 0.5, %v1278_v34  ;;  %v1288_v44 = vmul.f32 %v2922_v1, %v2922_v1  ;;  %v2938_v15 = vpop.f32.mrb[12].mxu1  ;;  %v2940_v51 = vpop.f32.mrb[14].mxu0 }
 0x5a3   :  { %v1357_v17 = vmax.f32 %v1349_v35, 0.0  ;;  %v1335_v48 = vmul.f32 0.5, %v1319_v60  ;;  %v1343_v49 = vmul.f32 %v2930_v61, %v2930_v61  ;;  %v1281_v43 = vadd.f32 %v2938_v15, %v2912_v3  ;;  %v2946_v59 = vpop.f32.mrb[13].mxu1  ;;  %v2948_v20 = vpop.f32.mrb[15].mxu0 }
 0x5a4   :  { %v1356_v21 = vmax.f32 %v1348_v11, 0.0  ;;  %v1334_v22 = vmul.f32 0.5, %v1318_v27  ;;  %v1342_v23 = vmul.f32 %v2934_v12, %v2934_v12  ;;  %v1297_v14 = vmul.f32 %v2938_v15, %v2938_v15  ;;  %v1001_v27 = vld [vmem:[%s3172_s6 + $0x8] sm:$0xff] }
 0x5a5   :  { %v1365_v39 = vadd.f32 1e-05, %v1357_v17  ;;  %v1351_v36 = vsub.f32 %v1335_v48, %v1343_v49  ;;  %v2954_v24 = vmul.f32 0.5, %v1281_v43  ;;  %v1280_v16 = vadd.f32 %v2946_v59, %v2922_v1  ;;  %v1000_v49 = vld [vmem:[%s3172_s6] sm:$0xff] }
 0x5a6   :  { %v1364_v63 = vadd.f32 1e-05, %v1356_v21  ;;  %v1350_v25 = vsub.f32 %v1334_v22, %v1342_v23  ;;  %v1321_v26 = vadd.f32 %v1297_v14, %v1289_v10  ;;  %v1296_v45 = vmul.f32 %v2946_v59, %v2946_v59  ;;  %v2960_v13 = vpop.f32.mrb[14].mxu1 }
 0x5a7   :  { %2366 = vrsqrt.f32 %v1365_v39  ;;  %v1359_v19 = vmax.f32 %v1351_v36, 0.0  ;;  %v1345_v28 = vmul.f32 %v2954_v24, %v2954_v24  ;;  %v2964_v30 = vmul.f32 0.5, %v1280_v16  ;;  %v2966_v31 = vpop.f32.mrb[15].mxu1  ;;  %v1950_v36 = vld [vmem:[%s3172_s6 + $0x48] sm:$0xff] }
 0x5a8   :  { %2368 = vrsqrt.f32 %v1364_v63  ;;  %v1358_v57 = vmax.f32 %v1350_v25, 0.0  ;;  %v1337_v32 = vmul.f32 0.5, %v1321_v26  ;;  %v1320_v4 = vadd.f32 %v1296_v45, %v1288_v44  ;;  %v1003_v63 = vld [vmem:[%s3172_s6 + $0x18] sm:$0xff] }
 0x5a9   :  { %v1367_v37 = vadd.f32 1e-05, %v1359_v19  ;;  %v1344_v38 = vmul.f32 %v2964_v30, %v2964_v30  ;;  %v1291_v47 = vmul.f32 %v2940_v51, %v2940_v51  ;;  %v1290_v40 = vmul.f32 %v2948_v20, %v2948_v20 }
 0x5aa   :  { %v1366_v50 = vadd.f32 1e-05, %v1358_v57  ;;  %v1353_v55 = vsub.f32 %v1337_v32, %v1345_v28  ;;  %v1336_v56 = vmul.f32 0.5, %v1320_v4  ;;  %v1283_v62 = vadd.f32 %v2960_v13, %v2940_v51  ;;  %v1949_v28 = vld [vmem:[%s3172_s6 + $0x40] sm:$0xff]  ;;  %v1002_v57 = vld [vmem:[%s3172_s6 + $0x10] sm:$0xff] }
 0x5ab   :  { %2370 = vrsqrt.f32 %v1367_v37  ;;  %v1299_v5 = vmul.f32 %v2960_v13, %v2960_v13  ;;  %v1282_v58 = vadd.f32 %v2966_v31, %v2948_v20  ;;  %v1298_v29 = vmul.f32 %v2966_v31, %v2966_v31 }
 0x5ac   :  { %2372 = vrsqrt.f32 %v1366_v50  ;;  %v1361_v0 = vmax.f32 %v1353_v55, 0.0  ;;  %v1352_v7 = vsub.f32 %v1336_v56, %v1344_v38  ;;  %v2982_v8 = vmul.f32 0.5, %v1283_v62  ;;  %v1952_v62 = vld [vmem:[%s3172_s6 + $0x58] sm:$0xff] }
 0x5ad   :  { %v1323_v34 = vadd.f32 %v1299_v5, %v1291_v47  ;;  %v1322_v9 = vadd.f32 %v1298_v29, %v1290_v40  ;;  %v2984_v35 = vmul.f32 0.5, %v1282_v58 }
 0x5ae   :  { %v1369_v60 = vadd.f32 1e-05, %v1361_v0  ;;  %v1360_v10 = vmax.f32 %v1352_v7, 0.0  ;;  %v1347_v11 = vmul.f32 %v2982_v8, %v2982_v8 }
 0x5af   :  { %v1339_v44 = vmul.f32 0.5, %v1323_v34  ;;  %v1338_v17 = vmul.f32 0.5, %v1322_v9  ;;  %v1346_v48 = vmul.f32 %v2984_v35, %v2984_v35 }
 0x5b0   :  { %2374 = vrsqrt.f32 %v1369_v60  ;;  %v1368_v43 = vadd.f32 1e-05, %v1360_v10 }
 0x5b1   :  { %v2367_v21 = vpop.eup %2366  ;;  %v1355_v22 = vsub.f32 %v1339_v44, %v1347_v11  ;;  %v1354_v23 = vsub.f32 %v1338_v17, %v1346_v48 }
 0x5b2   :  { %v2369_v14 = vpop.eup %2368  ;;  %v1381_v39 = vmul.f32 %v2367_v21, %v1001_v27  ;;  %2376 = vrsqrt.f32 %v1368_v43 }
 0x5b3   :  { %v1380_v16 = vmul.f32 %v2369_v14, %v1000_v49  ;;  %v1363_v25 = vmax.f32 %v1355_v22, 0.0  ;;  %v1362_v26 = vmax.f32 %v1354_v23, 0.0 }
 0x5b4   :  { %v1389_v45 = vmul.f32 %v1381_v39, %v2902_v52  ;;  %v1413_v19 = vmul.f32 %v2886_v33, %v1381_v39  ;;  %v1405_v32 = vmul.f32 %v2878_v54, %v1381_v39 }
 0x5b5   :  { %v2371_v4 = vpop.eup %2370  ;;  %v1388_v37 = vmul.f32 %v1380_v16, %v2906_v53  ;;  %v1412_v38 = vmul.f32 %v1380_v16, %v2894_v41  ;;  %v1371_v47 = vadd.f32 1e-05, %v1363_v25  ;;  %v1370_v40 = vadd.f32 1e-05, %v1362_v26  ;;  %v1951_v41 = vld [vmem:[%s3172_s6 + $0x50] sm:$0xff] }
 0x5b6   :  { %v2373_v52 = vpop.eup %2372  ;;  %v1397_v50 = vsub.f32 %v1950_v36, %v1389_v45  ;;  %v1383_v33 = vmul.f32 %v2371_v4, %v1003_v63  ;;  %v1404_v55 = vmul.f32 %v1380_v16, %v2880_v46  ;;  %v1005_v46 = vld [vmem:[%s3172_s6 + $0x28] sm:$0xff] }
 0x5b7   :  { %v1396_v56 = vsub.f32 %v1949_v28, %v1388_v37  ;;  %v1382_v5 = vmul.f32 %v2373_v52, %v1002_v57  ;;  %2378 = vrsqrt.f32 %v1371_v47 }
 0x5b8   :  { %v1429_v54 = vadd.f32 %v1413_v19, %v1397_v50  ;;  %v1391_v58 = vmul.f32 %v1383_v33, %v2930_v61  ;;  %v1415_v53 = vmul.f32 %v2910_v2, %v1383_v33  ;;  %2380 = vrsqrt.f32 %v1370_v40  ;;  %v1004_v2 = vld [vmem:[%s3172_s6 + $0x20] sm:$0xff] }
 0x5b9   :  { %v1428_v29 = vadd.f32 %v1412_v38, %v1396_v56  ;;  %v1390_v0 = vmul.f32 %v1382_v5, %v2934_v12  ;;  %v1414_v7 = vmul.f32 %v1382_v5, %v2920_v6  ;;  %v1420_v34 = vadd.f32 %v1404_v55, %v1396_v56  ;;  %v1954_v6 = vld [vmem:[%s3172_s6 + $0x68] sm:$0xff]  ;;  %v1956_v55 = vld [vmem:[%s3172_s6 + $0x78] sm:$0xff] }
 0x5ba   :  { %v2375_v9 = vpop.eup %2374  ;;  %v1399_v60 = vsub.f32 %v1952_v62, %v1391_v58  ;;  %v1421_v61 = vadd.f32 %v1405_v32, %v1397_v50  ;;  %v1445_v10 = vmax.f32 %v1429_v54, 0.0  ;;  %v1406_v11 = vmul.f32 %v1382_v5, %v2896_v42  ;;  %v1953_v42 = vld [vmem:[%s3172_s6 + $0x60] sm:$0xff] }
 0x5bb   :  { %v1398_v27 = vsub.f32 %v1951_v41, %v1390_v0  ;;  %v1385_v44 = vmul.f32 %v2375_v9, %v1005_v46  ;;  %v1436_v17 = vmax.f32 %v1420_v34, 0.0  ;;  %v1444_v48 = vmax.f32 %v1428_v29, 0.0 }
 0x5bc   :  { %v2377_v49 = vpop.eup %2376  ;;  %v1431_v43 = vadd.f32 %v1415_v53, %v1399_v60  ;;  %v1437_v12 = vmax.f32 %v1421_v61, 0.0  ;;  %v1407_v21 = vmul.f32 %v2888_v18, %v1383_v33  ;;  %v1007_v18 = vld [vmem:[%s3172_s6 + $0x38] sm:$0xff] }
 0x5bd   :  { %v1430_v22 = vadd.f32 %v1414_v7, %v1398_v27  ;;  %v1393_v23 = vmul.f32 %v1385_v44, %v2954_v24  ;;  %v1417_v14 = vmul.f32 %v2938_v15, %v1385_v44  ;;  %v1384_v39 = vmul.f32 %v2377_v49, %v1004_v2  ;;  %v1006_v15 = vld [vmem:[%s3172_s6 + $0x30] sm:$0xff]  ;;  %v1464_v49 = vld [vmem:[%s3171_s7 + $0x18] sm:$0xff] }
 0x5be   :  { %v2291_v36 = vpack.c.bf16 %v1437_v12, %v1436_v17  ;;  %v2307_v16 = vpack.c.bf16 %v1445_v10, %v1444_v48  ;;  %v1422_v63 = vadd.f32 %v1406_v11, %v1398_v27  ;;  %v1423_v25 = vadd.f32 %v1407_v21, %v1399_v60  ;;  %v1463_v48 = vld [vmem:[%s3171_s7 + $0x10] sm:$0xff] }
 0x5bf   :  { %v1401_v26 = vsub.f32 %v1954_v6, %v1393_v23  ;;  %v1392_v45 = vmul.f32 %v1384_v39, %v2964_v30  ;;  %v1416_v19 = vmul.f32 %v1384_v39, %v2946_v59  ;;  %v1446_v24 = vmax.f32 %v1430_v22, 0.0 }
 0x5c0   :  { %2292 = vmatprep.subr.bf16.mxu0 %v2291_v36  ;;  %2308 = vmatprep.subr.bf16.mxu1 %v2307_v16  ;;  %v1438_v28 = vmax.f32 %v1422_v63, 0.0  ;;  %v1439_v57 = vmax.f32 %v1423_v25, 0.0  ;;  %v1447_v32 = vmax.f32 %v1431_v43, 0.0  ;;  %v1408_v4 = vmul.f32 %v1384_v39, %v2922_v1  ;;  %v1743_v43 = vld [vmem:[%s3173_s9] sm:$0xff] }
 0x5c1   :  { %v2379_v37 = vpop.eup %2378  ;;  %v1433_v30 = vadd.f32 %v1417_v14, %v1401_v26  ;;  %v1400_v38 = vsub.f32 %v1953_v42, %v1392_v45  ;;  %2294 = vmatpush3.bf16.msra.mxu0 %v2291_v36  ;;  %2310 = vmatpush3.bf16.msra.mxu1 %v2307_v16  ;;  %v1409_v59 = vmul.f32 %v2912_v3, %v1385_v44  ;;  %v1955_v3 = vld [vmem:[%s3172_s6 + $0x70] sm:$0xff] }
 0x5c2   :  { %v2381_v47 = vpop.eup %2380  ;;  %v1387_v40 = vmul.f32 %v2379_v37, %v1007_v18  ;;  %v2295_v52 = vpack.c.bf16 %v1439_v57, %v1438_v28  ;;  %v2311_v50 = vpack.c.bf16 %v1447_v32, %v1446_v24 }
 0x5c3   :  { %v1432_v33 = vadd.f32 %v1416_v19, %v1400_v38  ;;  %v1386_v56 = vmul.f32 %v2381_v47, %v1006_v15  ;;  %v1424_v62 = vadd.f32 %v1408_v4, %v1400_v38  ;;  %v1425_v5 = vadd.f32 %v1409_v59, %v1401_v26 }
 0x5c4   :  { %v1395_v1 = vmul.f32 %v1387_v40, %v2982_v8  ;;  %v1419_v54 = vmul.f32 %v2960_v13, %v1387_v40  ;;  %2296 = vmatprep.subr.bf16.mxu0 %v2295_v52  ;;  %2312 = vmatprep.subr.bf16.mxu1 %v2311_v50  ;;  %v1449_v58 = vmax.f32 %v1433_v30, 0.0  ;;  %v1411_v53 = vmul.f32 %v2940_v51, %v1387_v40 }
 0x5c5   :  { %v1394_v41 = vmul.f32 %v1386_v56, %v2984_v35  ;;  %v1418_v46 = vmul.f32 %v1386_v56, %v2966_v31  ;;  %2298 = vmatpush3.bf16.msra.mxu0 %v2295_v52  ;;  %2314 = vmatpush3.bf16.msra.mxu1 %v2311_v50  ;;  %v1440_v29 = vmax.f32 %v1424_v62, 0.0  ;;  %v1441_v0 = vmax.f32 %v1425_v5, 0.0 }
 0x5c6   :  { %v1403_v8 = vsub.f32 %v1956_v55, %v1395_v1  ;;  %v1448_v7 = vmax.f32 %v1432_v33, 0.0  ;;  %v1410_v13 = vmul.f32 %v1386_v56, %v2948_v20  ;;  %v1462_v20 = vld [vmem:[%s3171_s7 + $0x8] sm:$0xff] }
 0x5c7   :  { %v1402_v34 = vsub.f32 %v1955_v3, %v1394_v41  ;;  %v2299_v9 = vpack.c.bf16 %v1441_v0, %v1440_v29 }
 0x5c8   :  { %v1435_v60 = vadd.f32 %v1419_v54, %v1403_v8  ;;  %v2315_v2 = vpack.c.bf16 %v1449_v58, %v1448_v7  ;;  %v1427_v61 = vadd.f32 %v1411_v53, %v1403_v8 }
 0x5c9   :  { %v1434_v10 = vadd.f32 %v1418_v46, %v1402_v34  ;;  %2300 = vmatprep.subr.bf16.mxu0 %v2299_v9  ;;  %v1426_v51 = vadd.f32 %v1410_v13, %v1402_v34 }
 0x5ca   :  { %2316 = vmatprep.subr.bf16.mxu1 %v2315_v2  ;;  %2302 = vmatpush3.bf16.msra.mxu0 %v2299_v9  ;;  %v1443_v35 = vmax.f32 %v1427_v61, 0.0  ;;  %v1451_v31 = vmax.f32 %v1435_v60, 0.0  ;;  %v1453_v9 = vld [vmem:[%s3174_s8 + $0x8] sm:$0xff]  ;;  %v1452_v60 = vld [vmem:[%s3174_s8] sm:$0xff] }
 0x5cb   :  { %2318 = vmatpush3.bf16.msra.mxu1 %v2315_v2  ;;  %v1442_v11 = vmax.f32 %v1426_v51, 0.0  ;;  %v1450_v27 = vmax.f32 %v1434_v10, 0.0  ;;  %v1974_v51 = vld [vmem:[%s3174_s8 + $0x28] sm:$0xff] }
 0x5cd   :  { %v2303_v44 = vpack.c.bf16 %v1443_v35, %v1442_v11  ;;  %v2319_v17 = vpack.c.bf16 %v1451_v31, %v1450_v27  ;;  %v1973_v27 = vld [vmem:[%s3174_s8 + $0x20] sm:$0xff] }
 0x5cf   :  { %2304 = vmatprep.subr.bf16.mxu0 %v2303_v44  ;;  %2320 = vmatprep.subr.bf16.mxu1 %v2319_v17 }
 0x5d0   :  { %2306 = vmatpush3.bf16.msra.mxu0 %v2303_v44  ;;  %2322 = vmatpush3.bf16.msra.mxu1 %v2319_v17  ;;  %v1455_v44 = vld [vmem:[%s3174_s8 + $0x18] sm:$0xff] }
 0x5d3   :  { %2194 = vmatmul.mubr.msk.f32.vlgmr.msra.gmra.mrb[16].mxu0 %vm1025_vm2, %v1462_v20  ;;  %2216 = vmatmul.mubr.msk.f32.vlgmr.msra.gmra.mrb[16].mxu1 %vm1025_vm2, %v1462_v20 }
 0x5d4   :  { %2196 = vmatprep.mubr.msk.f32.mxu0 %vm1025_vm2, %v1463_v48  ;;  %2218 = vmatprep.mubr.msk.f32.mxu1 %vm1025_vm2, %v1463_v48 }
 0x5d7   :  { %2197 = vmatmul.mubr.msk.f32.gmra.mrb[18].mxu0 %vm1025_vm2, %v1464_v49  ;;  %2219 = vmatmul.mubr.msk.f32.gmra.mrb[18].mxu1 %vm1025_vm2, %v1464_v49  ;;  %v1454_v49 = vld [vmem:[%s3174_s8 + $0x10] sm:$0xff] }
 0x5d8   :  { %2229 = vmatprep.mubr.msk.f32.mxu0 %vm381_vm1, %v1743_v43  ;;  %2240 = vmatprep.mubr.msk.f32.mxu1 %vm381_vm1, %v1743_v43 }
 0x6a6   :  { %v3082_v6 = vpop.f32.mrb[16].mxu0  ;;  %v2217_v12 = vpop.f32.mrb[16].mxu1 }
 0x6a7   :  { %v1660_v21 = vmul.f32 %v3082_v6, %v3082_v6  ;;  %v1656_v22 = vadd.f32 %v2217_v12, %v3082_v6  ;;  %v1664_v23 = vmul.f32 %v2217_v12, %v2217_v12  ;;  %v3087_v14 = vpop.f32.mrb[17].mxu0  ;;  %v1628_v39 = vpop.f32.mrb[17].mxu1 }
 0x6a8   :  { %v1659_v42 = vmul.f32 %v3087_v14, %v3087_v14  ;;  %v1655_v36 = vadd.f32 %v1628_v39, %v3087_v14  ;;  %v1663_v16 = vmul.f32 %v1628_v39, %v1628_v39 }
 0x6a9   :  { %v1676_v63 = vadd.f32 %v1664_v23, %v1660_v21  ;;  %v1680_v25 = vmul.f32 0.5, %v1656_v22 }
 0x6aa   :  { %v1675_v26 = vadd.f32 %v1663_v16, %v1659_v42  ;;  %v1679_v45 = vmul.f32 0.5, %v1655_v36  ;;  %v3092_v19 = vpop.f32.mrb[18].mxu0  ;;  %v3094_v18 = vpop.f32.mrb[18].mxu1  ;;  %v1976_v16 = vld [vmem:[%s3174_s8 + $0x38] sm:$0xff] }
 0x6ab   :  { %v1684_v24 = vmul.f32 0.5, %v1676_v63  ;;  %v1688_v15 = vmul.f32 %v1680_v25, %v1680_v25  ;;  %v1662_v28 = vmul.f32 %v3092_v19, %v3092_v19  ;;  %v1658_v57 = vadd.f32 %v3094_v18, %v3092_v19  ;;  %v3100_v32 = vpop.f32.mrb[19].mxu0  ;;  %v3102_v4 = vpop.f32.mrb[19].mxu1 }
 0x6ac   :  { %v1683_v37 = vmul.f32 0.5, %v1675_v26  ;;  %v1687_v30 = vmul.f32 %v1679_v45, %v1679_v45  ;;  %v1666_v38 = vmul.f32 %v3094_v18, %v3094_v18  ;;  %v1661_v59 = vmul.f32 %v3100_v32, %v3100_v32 }
 0x6ad   :  { %v1692_v47 = vsub.f32 %v1684_v24, %v1688_v15  ;;  %v1682_v40 = vmul.f32 0.5, %v1658_v57  ;;  %v1657_v52 = vadd.f32 %v3102_v4, %v3100_v32  ;;  %v1665_v50 = vmul.f32 %v3102_v4, %v3102_v4 }
 0x6ae   :  { %v1691_v33 = vsub.f32 %v1683_v37, %v1687_v30  ;;  %v1678_v55 = vadd.f32 %v1666_v38, %v1662_v28 }
 0x6af   :  { %v1696_v56 = vmax.f32 %v1692_v47, 0.0  ;;  %v1690_v62 = vmul.f32 %v1682_v40, %v1682_v40  ;;  %v1677_v5 = vadd.f32 %v1665_v50, %v1661_v59  ;;  %v1681_v1 = vmul.f32 0.5, %v1657_v52 }
 0x6b0   :  { %v1695_v54 = vmax.f32 %v1691_v33, 0.0  ;;  %v1686_v3 = vmul.f32 0.5, %v1678_v55 }
 0x6b1   :  { %v1700_v58 = vadd.f32 1e-05, %v1696_v56  ;;  %v1685_v53 = vmul.f32 0.5, %v1677_v5  ;;  %v1689_v41 = vmul.f32 %v1681_v1, %v1681_v1 }
 0x6b2   :  { %v1699_v46 = vadd.f32 1e-05, %v1695_v54  ;;  %v1694_v29 = vsub.f32 %v1686_v3, %v1690_v62 }
 0x6b3   :  { %2382 = vrsqrt.f32 %v1700_v58  ;;  %v1693_v0 = vsub.f32 %v1685_v53, %v1689_v41  ;;  %v1745_v58 = vld [vmem:[%s3175_s10] sm:$0xff] }
 0x6b4   :  { %2384 = vrsqrt.f32 %v1699_v46  ;;  %v1698_v8 = vmax.f32 %v1694_v29, 0.0 }
 0x6b5   :  { %v1697_v7 = vmax.f32 %v1693_v0, 0.0 }
 0x6b6   :  { %v1702_v13 = vadd.f32 1e-05, %v1698_v8 }
 0x6b7   :  { %v1701_v34 = vadd.f32 1e-05, %v1697_v7 }
 0x6b8   :  { %2386 = vrsqrt.f32 %v1702_v13 }
 0x6b9   :  { %2388 = vrsqrt.f32 %v1701_v34 }
 0x6bd   :  { %v2383_v2 = vpop.eup %2382 }
 0x6be   :  { %v2385_v61 = vpop.eup %2384  ;;  %v1708_v10 = vmul.f32 %v2383_v2, %v1453_v9 }
 0x6bf   :  { %v1707_v35 = vmul.f32 %v2385_v61, %v1452_v60 }
 0x6c0   :  { %v1712_v31 = vmul.f32 %v1708_v10, %v1680_v25  ;;  %v1724_v11 = vmul.f32 %v2217_v12, %v1708_v10  ;;  %v1720_v17 = vmul.f32 %v3082_v6, %v1708_v10 }
 0x6c1   :  { %v1711_v20 = vmul.f32 %v1707_v35, %v1679_v45  ;;  %v1723_v48 = vmul.f32 %v1707_v35, %v1628_v39  ;;  %v1719_v43 = vmul.f32 %v1707_v35, %v3087_v14  ;;  %v1975_v14 = vld [vmem:[%s3174_s8 + $0x30] sm:$0xff] }
 0x6c2   :  { %v2387_v21 = vpop.eup %2386  ;;  %v1716_v12 = vsub.f32 %v1974_v51, %v1712_v31 }
 0x6c3   :  { %v2389_v22 = vpop.eup %2388  ;;  %v1715_v23 = vsub.f32 %v1973_v27, %v1711_v20  ;;  %v1710_v42 = vmul.f32 %v2387_v21, %v1455_v44 }
 0x6c4   :  { %v1732_v36 = vadd.f32 %v1724_v11, %v1716_v12  ;;  %v1709_v63 = vmul.f32 %v2389_v22, %v1454_v49  ;;  %v1728_v6 = vadd.f32 %v1720_v17, %v1716_v12 }
 0x6c5   :  { %v1731_v25 = vadd.f32 %v1723_v48, %v1715_v23  ;;  %v1714_v39 = vmul.f32 %v1710_v42, %v1682_v40  ;;  %v1726_v26 = vmul.f32 %v3094_v18, %v1710_v42  ;;  %v1727_v45 = vadd.f32 %v1719_v43, %v1715_v23 }
 0x6c6   :  { %v1713_v24 = vmul.f32 %v1709_v63, %v1681_v1  ;;  %v1725_v15 = vmul.f32 %v1709_v63, %v3102_v4  ;;  %v1736_v28 = vmax.f32 %v1728_v6, 0.0  ;;  %v1740_v57 = vmax.f32 %v1732_v36, 0.0 }
 0x6c7   :  { %v1718_v37 = vsub.f32 %v1976_v16, %v1714_v39  ;;  %v1735_v30 = vmax.f32 %v1727_v45, 0.0  ;;  %v1739_v38 = vmax.f32 %v1731_v25, 0.0  ;;  %v1721_v59 = vmul.f32 %v1709_v63, %v3100_v32  ;;  %v1746_v32 = vld [vmem:[%s3175_s10 + $0x8] sm:$0x1] }
 0x6c8   :  { %v1717_v47 = vsub.f32 %v1975_v14, %v1713_v24  ;;  %v1722_v40 = vmul.f32 %v3092_v19, %v1710_v42  ;;  %v1744_v19 = vld [vmem:[%s3173_s9 + $0x8] sm:$0x1] }
 0x6c9   :  { %v1734_v52 = vadd.f32 %v1726_v26, %v1718_v37  ;;  %v2323_v18 = vpack.c.bf16 %v1736_v28, %v1735_v30  ;;  %v2331_v50 = vpack.c.bf16 %v1740_v57, %v1739_v38 }
 0x6ca   :  { %v1733_v33 = vadd.f32 %v1725_v15, %v1717_v47  ;;  %v1729_v55 = vadd.f32 %v1721_v59, %v1717_v47  ;;  %v1730_v56 = vadd.f32 %v1722_v40, %v1718_v37 }
 0x6cb   :  { %2324 = vmatprep.subr.bf16.mxu0 %v2323_v18  ;;  %2332 = vmatprep.subr.bf16.mxu1 %v2331_v50  ;;  %v1742_v62 = vmax.f32 %v1734_v52, 0.0 }
 0x6cc   :  { %2326 = vmatpush3.bf16.msra.mxu0 %v2323_v18  ;;  %2334 = vmatpush3.bf16.msra.mxu1 %v2331_v50  ;;  %v1737_v4 = vmax.f32 %v1729_v55, 0.0  ;;  %v1738_v5 = vmax.f32 %v1730_v56, 0.0  ;;  %v1741_v1 = vmax.f32 %v1733_v33, 0.0 }
 0x6ce   :  { %v2327_v54 = vpack.c.bf16 %v1738_v5, %v1737_v4  ;;  %v2335_v3 = vpack.c.bf16 %v1742_v62, %v1741_v1 }
 0x6d0   :  { %2328 = vmatprep.subr.bf16.mxu0 %v2327_v54  ;;  %2336 = vmatprep.subr.bf16.mxu1 %v2335_v3 }
 0x6d1   :  { %2330 = vmatpush3.bf16.msra.mxu0 %v2327_v54  ;;  %2338 = vmatpush3.bf16.msra.mxu1 %v2335_v3 }
 0x6d4   :  { %2230 = vmatmul.mubr.msk.f32.vlgmr.msra.gmra.mrb[20].mxu0 %vm381_vm1, %v1744_v19  ;;  %2241 = vmatmul.mubr.msk.f32.vlgmr.msra.gmra.mrb[20].mxu1 %vm381_vm1, %v1744_v19 }
 0x7a7   :  { %v2231_v53 = vpop.f32.mrb[20].mxu0  ;;  %v2242_v41 = vpop.f32.mrb[20].mxu1 }
 0x7a8   :  { %v1825_v46 = vadd.f32 %v2231_v53, %v1746_v32  ;;  %v1900_v29 = vadd.f32 %v2242_v41, %v1746_v32  ;;  %v1819_v0 = vpop.f32.mrb[21].mxu0  ;;  %v1894_v8 = vpop.f32.mrb[21].mxu1 }
 0x7a9   :  { %v1820_v7 = vadd.f32 %v1819_v0, %v1745_v58  ;;  %v1895_v13 = vadd.f32 %v1894_v8, %v1745_v58 }
 0x7aa   :  { %1906 = vst.msk [vmem:[%s3176_s11 + $0x8] sm:$0x1] %vm1905_vm3, %v1825_v46  ;;  %1908 = vst.msk [vmem:[%s3176_s11 + $0x18] sm:$0x1] %vm1905_vm3, %v1900_v29 }
 0x7ab   :  { %1904 = vst.msk [vmem:[%s3176_s11] sm:$0xff] %vm1903_vm4, %v1820_v7  ;;  %1907 = vst.msk [vmem:[%s3176_s11 + $0x10] sm:$0xff] %vm1903_vm4, %v1895_v13 }

</bundles_post_ra>
